<compile_context>
chip_gen: v7x
topology: tpu7x:2x2x1
jax: 0.10.0
libtpu: 0.0.40
codegen_flags: <defaults>
</compile_context>

<pallas_src>
import jax
import jax.numpy as jnp
from jax.experimental import pallas as pl
from jax.experimental.pallas import tpu as pltpu


def planner_kernel(x_ref,
                   w1_ref, b1_ref,
                   w2_ref, b2_ref,
                   w3_ref, b3_ref,
                   w4_ref, b4_ref,
                   out_ref):
    # All four layers fused; activations stay in vregs/VMEM between layers.
    compute_dtype = w1_ref.dtype          # f32 or bf16 weights; f32 accumulation.
    x = x_ref[...].astype(compute_dtype)

    h = jnp.dot(x, w1_ref[...], preferred_element_type=jnp.float32) + b1_ref[...]
    h = jnp.maximum(h, 0.0).astype(compute_dtype)

    h = jnp.dot(h, w2_ref[...], preferred_element_type=jnp.float32) + b2_ref[...]
    h = jnp.maximum(h, 0.0).astype(compute_dtype)

    h = jnp.dot(h, w3_ref[...], preferred_element_type=jnp.float32) + b3_ref[...]
    h = jnp.maximum(h, 0.0).astype(compute_dtype)

    actions = jnp.dot(h, w4_ref[...], preferred_element_type=jnp.float32) + b4_ref[...]
    out_ref[...] = actions.astype(out_ref.dtype)


def _round_up(x, m):
    return ((x + m - 1) // m) * m


def _cdiv(a, b):
    return (a + b - 1) // b


def _choose_tiling(B, tm_max):
    """Pick (tile_rows, padded_batch).

    Small batches: one tile of round_up(B, 8) rows (sublane minimum) — no 256-row
    padding waste. Large batches: at least 2 blocks (keeps a v7x second
    TensorCore busy), tiles capped at tm_max rows.
    """
    if B <= 256:
        tm = _round_up(max(B, 1), 8)
        return tm, tm
    n_blocks = max(2, _cdiv(B, tm_max))
    tm = _round_up(_cdiv(B, n_blocks), 8)
    return tm, n_blocks * tm


def planner_forward(x, params, *, tm_max=2048):
    """x: [B, 2*goal] float32 -> actions: [B, goal] float32."""
    (w1, b1), (w2, b2), (w3, b3), (w4, b4) = params
    B, in_dim = x.shape
    hidden = w1.shape[1]
    goal = w4.shape[1]

    tm, Bp = _choose_tiling(B, tm_max)
    if Bp != B:
        x = jnp.pad(x, ((0, Bp - B), (0, 0)))
    grid = (Bp // tm,)

    # Advisory cost for the XLA scheduler.
    flops = 2 * Bp * (in_dim * hidden + 2 * hidden * hidden + hidden * goal)
    bytes_accessed = sum(int(a.size) * a.dtype.itemsize
                         for a in (x, w1, b1, w2, b2, w3, b3, w4, b4))
    bytes_accessed += Bp * goal * 4
    cost = pl.CostEstimate(flops=flops, transcendentals=0,
                           bytes_accessed=bytes_accessed)

    # Rough per-step VMEM footprint; only raise the scoped limit when we would
    # actually threaten v5e's conservative 16 MiB default.
    act_bytes = 4 * tm * hidden * 4                         # fused f32 activations
    io_bytes = 2 * (tm * max(in_dim, 128) * x.dtype.itemsize
                    + tm * max(goal, 128) * 4)              # double-buffered x/out
    w_bytes = 2 * sum(int(a.size) * a.dtype.itemsize
                      for a in (w1, b1, w2, b2, w3, b3, w4, b4))
    est_vmem = act_bytes + io_bytes + w_bytes
    vmem_limit = 32 * 1024 * 1024 if est_vmem > 12 * 1024 * 1024 else None

    compiler_params = pltpu.CompilerParams(
        # Batch axis is independent per block -> safe to mark "parallel".
        # TODO(synk): on v7x, profile pltpu.CORE_PARALLEL / core_map to guarantee a
        # 2-TensorCore split of the batch grid.
        dimension_semantics=("parallel",),
        vmem_limit_bytes=vmem_limit,
    )

    def build(single_buffer_weights):
        def const_spec(shape):
            # Constant block index across the grid -> weights stay resident;
            # single-buffer them to halve their VMEM footprint when supported.
            if single_buffer_weights:
                return pl.BlockSpec(shape, lambda i: (0, 0),
                                    pipeline_mode=pl.Buffered(1))
            return pl.BlockSpec(shape, lambda i: (0, 0))

        in_specs = [
            pl.BlockSpec((tm, in_dim), lambda i: (i, 0)),
            const_spec((in_dim, hidden)), const_spec((1, hidden)),
            const_spec((hidden, hidden)), const_spec((1, hidden)),
            const_spec((hidden, hidden)), const_spec((1, hidden)),
            const_spec((hidden, goal)), const_spec((1, goal)),
        ]
        # Last output dim == full array dim (goal) -> legal block, no lane padding.
        out_spec = pl.BlockSpec((tm, goal), lambda i: (i, 0))

        return pl.pallas_call(
            planner_kernel,
            out_shape=jax.ShapeDtypeStruct((Bp, goal), jnp.float32),
            grid=grid,
            in_specs=in_specs,
            out_specs=out_spec,
            compiler_params=compiler_params,
            cost_estimate=cost,
        )

    args = (x, w1, b1, w2, b2, w3, b3, w4, b4)
    try:
        out = build(True)(*args)
    except Exception:
        # pipeline_mode=Buffered(1) unsupported on this jax version -> default
        # double-buffered constant inputs (still tiny: ~0.7 MB of weights).
        out = build(False)(*args)

    return out[:B] if Bp != B else out


# ----------------------------- parameters / reference -----------------------------

def xavier_uniform(key, fan_in, fan_out, gain=1.0):
    # Matches torch.nn.init.xavier_uniform_ semantics (weight pre-transposed to [in, out]).
    limit = gain * float(jnp.sqrt(6.0 / (fan_in + fan_out)))
    return jax.random.uniform(key, (fan_in, fan_out), dtype=jnp.float32,
                              minval=-limit, maxval=limit)


def init_planner_params(key, goal_dim, hidden=256, weight_dtype=jnp.float32):
    in_dim = 2 * goal_dim
    k1, k2, k3, k4 = jax.random.split(key, 4)

    def layer(k, fi, fo):
        w = xavier_uniform(k, fi, fo).astype(weight_dtype)
        b = jnp.zeros((1, fo), jnp.float32)
        return w, b

    return (layer(k1, in_dim, hidden),
            layer(k2, hidden, hidden),
            layer(k3, hidden, hidden),
            layer(k4, hidden, goal_dim))


def planner_ref(x, params):
    """Pure-JAX f32 reference for correctness checking."""
    (w1, b1), (w2, b2), (w3, b3), (w4, b4) = params
    f = jnp.float32
    h = jnp.maximum(x.astype(f) @ w1.astype(f) + b1, 0.0)
    h = jnp.maximum(h @ w2.astype(f) + b2, 0.0)
    h = jnp.maximum(h @ w3.astype(f) + b3, 0.0)
    return h @ w4.astype(f) + b4


if __name__ == "__main__":
    key = jax.random.PRNGKey(0)
    goal_dim = 4          # env_params['goal']
    batch = 8

    k_params, k_x = jax.random.split(key)
    x = jax.random.normal(k_x, (batch, 2 * goal_dim), dtype=jnp.float32)

    # f32-weight path: must match the PyTorch-equivalent reference tightly.
    params_f32 = init_planner_params(k_params, goal_dim, weight_dtype=jnp.float32)
    out_f32 = jax.block_until_ready(planner_forward(x, params_f32))
    ref = planner_ref(x, params_f32)
    assert out_f32.shape == (batch, goal_dim)
    assert jnp.allclose(out_f32, ref, atol=1e-5, rtol=1e-5)

    # bf16-weight fast path (f32 accumulation): looser tolerance vs. f32 reference.
    params_bf16 = init_planner_params(k_params, goal_dim, weight_dtype=jnp.bfloat16)
    out_bf16 = jax.block_until_ready(planner_forward(x, params_bf16))
    assert out_bf16.shape == (batch, goal_dim)
    assert jnp.allclose(out_bf16, ref, atol=5e-2, rtol=5e-2)

    print("KERNEL_OK")
</pallas_src>

<mosaic_0001>
module attributes {stable_mosaic.version = 11 : i64} {
  func.func @planner_kernel(%arg0: i32, %arg1: memref<8x8xf32, #tpu.memory_space<vmem>>, %arg2: memref<8x256xf32, #tpu.memory_space<vmem>>, %arg3: memref<1x256xf32, #tpu.memory_space<vmem>>, %arg4: memref<256x256xf32, #tpu.memory_space<vmem>>, %arg5: memref<1x256xf32, #tpu.memory_space<vmem>>, %arg6: memref<256x256xf32, #tpu.memory_space<vmem>>, %arg7: memref<1x256xf32, #tpu.memory_space<vmem>>, %arg8: memref<256x4xf32, #tpu.memory_space<vmem>>, %arg9: memref<1x4xf32, #tpu.memory_space<vmem>>, %arg10: memref<8x4xf32, #tpu.memory_space<vmem>>) attributes {dimension_semantics = [#tpu.dimension_semantics<parallel>], iteration_bounds = array<i64: 1>, scalar_prefetch = 0 : i64, scratch_operands = 0 : i64, tpu.core_type = #tpu.core_type<tc>, window_params = [{transform_indices = @transform_0, window_bounds = array<i64: 8, 8>}, {pipeline_mode = #tpu.pipeline_mode<synchronous>, transform_indices = @transform_1, window_bounds = array<i64: 8, 256>}, {pipeline_mode = #tpu.pipeline_mode<synchronous>, transform_indices = @transform_2, window_bounds = array<i64: 1, 256>}, {pipeline_mode = #tpu.pipeline_mode<synchronous>, transform_indices = @transform_3, window_bounds = array<i64: 256, 256>}, {pipeline_mode = #tpu.pipeline_mode<synchronous>, transform_indices = @transform_4, window_bounds = array<i64: 1, 256>}, {pipeline_mode = #tpu.pipeline_mode<synchronous>, transform_indices = @transform_5, window_bounds = array<i64: 256, 256>}, {pipeline_mode = #tpu.pipeline_mode<synchronous>, transform_indices = @transform_6, window_bounds = array<i64: 1, 256>}, {pipeline_mode = #tpu.pipeline_mode<synchronous>, transform_indices = @transform_7, window_bounds = array<i64: 256, 4>}, {pipeline_mode = #tpu.pipeline_mode<synchronous>, transform_indices = @transform_8, window_bounds = array<i64: 1, 4>}, {transform_indices = @transform_9, window_bounds = array<i64: 8, 4>}]} {
    %c0 = arith.constant 0 : index
    %c0_0 = arith.constant 0 : index
    %0 = vector.load %arg1[%c0, %c0_0] : memref<8x8xf32, #tpu.memory_space<vmem>>, vector<8x8xf32>
    %c0_1 = arith.constant 0 : index
    %c0_2 = arith.constant 0 : index
    %1 = vector.load %arg2[%c0_1, %c0_2] : memref<8x256xf32, #tpu.memory_space<vmem>>, vector<8x256xf32>
    %cst = arith.constant dense<0.000000e+00> : vector<8x256xf32>
    %2 = tpu.matmul %0, %1, %cst {dimension_numbers = #tpu.dot_dimension_numbers<[1], [0], [0], [1], [0, 0, 1, 1], [], []>} : vector<8x8xf32>, vector<8x256xf32>, vector<8x256xf32> -> vector<8x256xf32>
    %c0_3 = arith.constant 0 : index
    %c0_4 = arith.constant 0 : index
    %3 = vector.load %arg3[%c0_3, %c0_4] : memref<1x256xf32, #tpu.memory_space<vmem>>, vector<1x256xf32>
    %4 = vector.broadcast %3 : vector<1x256xf32> to vector<8x256xf32>
    %5 = arith.addf %2, %4 : vector<8x256xf32>
    %cst_5 = arith.constant 0.000000e+00 : f32
    %6 = vector.broadcast %cst_5 : f32 to vector<8x256xf32>
    %7 = arith.maximumf %5, %6 : vector<8x256xf32>
    %c0_6 = arith.constant 0 : index
    %c0_7 = arith.constant 0 : index
    %8 = vector.load %arg4[%c0_6, %c0_7] : memref<256x256xf32, #tpu.memory_space<vmem>>, vector<256x256xf32>
    %cst_8 = arith.constant dense<0.000000e+00> : vector<8x256xf32>
    %9 = tpu.matmul %7, %8, %cst_8 {dimension_numbers = #tpu.dot_dimension_numbers<[1], [0], [0], [1], [0, 0, 1, 1], [], []>} : vector<8x256xf32>, vector<256x256xf32>, vector<8x256xf32> -> vector<8x256xf32>
    %c0_9 = arith.constant 0 : index
    %c0_10 = arith.constant 0 : index
    %10 = vector.load %arg5[%c0_9, %c0_10] : memref<1x256xf32, #tpu.memory_space<vmem>>, vector<1x256xf32>
    %11 = vector.broadcast %10 : vector<1x256xf32> to vector<8x256xf32>
    %12 = arith.addf %9, %11 : vector<8x256xf32>
    %cst_11 = arith.constant 0.000000e+00 : f32
    %13 = vector.broadcast %cst_11 : f32 to vector<8x256xf32>
    %14 = arith.maximumf %12, %13 : vector<8x256xf32>
    %c0_12 = arith.constant 0 : index
    %c0_13 = arith.constant 0 : index
    %15 = vector.load %arg6[%c0_12, %c0_13] : memref<256x256xf32, #tpu.memory_space<vmem>>, vector<256x256xf32>
    %cst_14 = arith.constant dense<0.000000e+00> : vector<8x256xf32>
    %16 = tpu.matmul %14, %15, %cst_14 {dimension_numbers = #tpu.dot_dimension_numbers<[1], [0], [0], [1], [0, 0, 1, 1], [], []>} : vector<8x256xf32>, vector<256x256xf32>, vector<8x256xf32> -> vector<8x256xf32>
    %c0_15 = arith.constant 0 : index
    %c0_16 = arith.constant 0 : index
    %17 = vector.load %arg7[%c0_15, %c0_16] : memref<1x256xf32, #tpu.memory_space<vmem>>, vector<1x256xf32>
    %18 = vector.broadcast %17 : vector<1x256xf32> to vector<8x256xf32>
    %19 = arith.addf %16, %18 : vector<8x256xf32>
    %cst_17 = arith.constant 0.000000e+00 : f32
    %20 = vector.broadcast %cst_17 : f32 to vector<8x256xf32>
    %21 = arith.maximumf %19, %20 : vector<8x256xf32>
    %c0_18 = arith.constant 0 : index
    %c0_19 = arith.constant 0 : index
    %22 = vector.load %arg8[%c0_18, %c0_19] : memref<256x4xf32, #tpu.memory_space<vmem>>, vector<256x4xf32>
    %cst_20 = arith.constant dense<0.000000e+00> : vector<8x4xf32>
    %23 = tpu.matmul %21, %22, %cst_20 {dimension_numbers = #tpu.dot_dimension_numbers<[1], [0], [0], [1], [0, 0, 1, 1], [], []>} : vector<8x256xf32>, vector<256x4xf32>, vector<8x4xf32> -> vector<8x4xf32>
    %c0_21 = arith.constant 0 : index
    %c0_22 = arith.constant 0 : index
    %24 = vector.load %arg9[%c0_21, %c0_22] : memref<1x4xf32, #tpu.memory_space<vmem>>, vector<1x4xf32>
    %25 = vector.broadcast %24 : vector<1x4xf32> to vector<8x4xf32>
    %26 = arith.addf %23, %25 : vector<8x4xf32>
    %c0_23 = arith.constant 0 : index
    %c0_24 = arith.constant 0 : index
    %27 = vector.load %arg10[%c0_23, %c0_24] : memref<8x4xf32, #tpu.memory_space<vmem>>, vector<8x4xf32>
    tpu.vector_store %arg10[%c0_23, %c0_24], %26 {strides = array<i32>} : memref<8x4xf32, #tpu.memory_space<vmem>>, vector<8x4xf32>,
    return
  }
  func.func @transform_0(%arg0: i32) -> (i32, i32) {
    %c0_i32 = arith.constant 0 : i32
    %c0_i32_0 = arith.constant 0 : i32
    return %arg0, %c0_i32 : i32, i32
  }
  func.func @transform_1(%arg0: i32) -> (i32, i32) {
    %c0_i32 = arith.constant 0 : i32
    %c0_i32_0 = arith.constant 0 : i32
    %c0_i32_1 = arith.constant 0 : i32
    return %c0_i32, %c0_i32_0 : i32, i32
  }
  func.func @transform_2(%arg0: i32) -> (i32, i32) {
    %c0_i32 = arith.constant 0 : i32
    %c0_i32_0 = arith.constant 0 : i32
    %c0_i32_1 = arith.constant 0 : i32
    return %c0_i32, %c0_i32_0 : i32, i32
  }
  func.func @transform_3(%arg0: i32) -> (i32, i32) {
    %c0_i32 = arith.constant 0 : i32
    %c0_i32_0 = arith.constant 0 : i32
    %c0_i32_1 = arith.constant 0 : i32
    return %c0_i32, %c0_i32_0 : i32, i32
  }
  func.func @transform_4(%arg0: i32) -> (i32, i32) {
    %c0_i32 = arith.constant 0 : i32
    %c0_i32_0 = arith.constant 0 : i32
    %c0_i32_1 = arith.constant 0 : i32
    return %c0_i32, %c0_i32_0 : i32, i32
  }
  func.func @transform_5(%arg0: i32) -> (i32, i32) {
    %c0_i32 = arith.constant 0 : i32
    %c0_i32_0 = arith.constant 0 : i32
    %c0_i32_1 = arith.constant 0 : i32
    return %c0_i32, %c0_i32_0 : i32, i32
  }
  func.func @transform_6(%arg0: i32) -> (i32, i32) {
    %c0_i32 = arith.constant 0 : i32
    %c0_i32_0 = arith.constant 0 : i32
    %c0_i32_1 = arith.constant 0 : i32
    return %c0_i32, %c0_i32_0 : i32, i32
  }
  func.func @transform_7(%arg0: i32) -> (i32, i32) {
    %c0_i32 = arith.constant 0 : i32
    %c0_i32_0 = arith.constant 0 : i32
    %c0_i32_1 = arith.constant 0 : i32
    return %c0_i32, %c0_i32_0 : i32, i32
  }
  func.func @transform_8(%arg0: i32) -> (i32, i32) {
    %c0_i32 = arith.constant 0 : i32
    %c0_i32_0 = arith.constant 0 : i32
    %c0_i32_1 = arith.constant 0 : i32
    return %c0_i32, %c0_i32_0 : i32, i32
  }
  func.func @transform_9(%arg0: i32) -> (i32, i32) {
    %c0_i32 = arith.constant 0 : i32
    %c0_i32_0 = arith.constant 0 : i32
    return %arg0, %c0_i32 : i32, i32
  }
}

module attributes {stable_mosaic.version = 11 : i64} {
  func.func @planner_kernel(%arg0: i32, %arg1: memref<8x8xf32, #tpu.memory_space<vmem>>, %arg2: memref<8x256xf32, #tpu.memory_space<vmem>>, %arg3: memref<1x256xf32, #tpu.memory_space<vmem>>, %arg4: memref<256x256xf32, #tpu.memory_space<vmem>>, %arg5: memref<1x256xf32, #tpu.memory_space<vmem>>, %arg6: memref<256x256xf32, #tpu.memory_space<vmem>>, %arg7: memref<1x256xf32, #tpu.memory_space<vmem>>, %arg8: memref<256x4xf32, #tpu.memory_space<vmem>>, %arg9: memref<1x4xf32, #tpu.memory_space<vmem>>, %arg10: memref<8x4xf32, #tpu.memory_space<vmem>>) attributes {dimension_semantics = [#tpu.dimension_semantics<parallel>], iteration_bounds = array<i64: 1>, scalar_prefetch = 0 : i64, scratch_operands = 0 : i64, tpu.core_type = #tpu.core_type<tc>, window_params = [{transform_indices = @transform_0, window_bounds = array<i64: 8, 8>}, {pipeline_mode = #tpu.pipeline_mode<synchronous>, transform_indices = @transform_1, window_bounds = array<i64: 8, 256>}, {pipeline_mode = #tpu.pipeline_mode<synchronous>, transform_indices = @transform_2, window_bounds = array<i64: 1, 256>}, {pipeline_mode = #tpu.pipeline_mode<synchronous>, transform_indices = @transform_3, window_bounds = array<i64: 256, 256>}, {pipeline_mode = #tpu.pipeline_mode<synchronous>, transform_indices = @transform_4, window_bounds = array<i64: 1, 256>}, {pipeline_mode = #tpu.pipeline_mode<synchronous>, transform_indices = @transform_5, window_bounds = array<i64: 256, 256>}, {pipeline_mode = #tpu.pipeline_mode<synchronous>, transform_indices = @transform_6, window_bounds = array<i64: 1, 256>}, {pipeline_mode = #tpu.pipeline_mode<synchronous>, transform_indices = @transform_7, window_bounds = array<i64: 256, 4>}, {pipeline_mode = #tpu.pipeline_mode<synchronous>, transform_indices = @transform_8, window_bounds = array<i64: 1, 4>}, {transform_indices = @transform_9, window_bounds = array<i64: 8, 4>}]} {
    %c0 = arith.constant 0 : index
    %c0_0 = arith.constant 0 : index
    %0 = vector.load %arg1[%c0, %c0_0] : memref<8x8xf32, #tpu.memory_space<vmem>>, vector<8x8xf32>
    %c0_1 = arith.constant 0 : index
    %c0_2 = arith.constant 0 : index
    %1 = vector.load %arg2[%c0_1, %c0_2] : memref<8x256xf32, #tpu.memory_space<vmem>>, vector<8x256xf32>
    %cst = arith.constant dense<0.000000e+00> : vector<8x256xf32>
    %2 = tpu.matmul %0, %1, %cst {dimension_numbers = #tpu.dot_dimension_numbers<[1], [0], [0], [1], [0, 0, 1, 1], [], []>} : vector<8x8xf32>, vector<8x256xf32>, vector<8x256xf32> -> vector<8x256xf32>
    %c0_3 = arith.constant 0 : index
    %c0_4 = arith.constant 0 : index
    %3 = vector.load %arg3[%c0_3, %c0_4] : memref<1x256xf32, #tpu.memory_space<vmem>>, vector<1x256xf32>
    %4 = vector.broadcast %3 : vector<1x256xf32> to vector<8x256xf32>
    %5 = arith.addf %2, %4 : vector<8x256xf32>
    %cst_5 = arith.constant 0.000000e+00 : f32
    %6 = vector.broadcast %cst_5 : f32 to vector<8x256xf32>
    %7 = arith.maximumf %5, %6 : vector<8x256xf32>
    %c0_6 = arith.constant 0 : index
    %c0_7 = arith.constant 0 : index
    %8 = vector.load %arg4[%c0_6, %c0_7] : memref<256x256xf32, #tpu.memory_space<vmem>>, vector<256x256xf32>
    %cst_8 = arith.constant dense<0.000000e+00> : vector<8x256xf32>
    %9 = tpu.matmul %7, %8, %cst_8 {dimension_numbers = #tpu.dot_dimension_numbers<[1], [0], [0], [1], [0, 0, 1, 1], [], []>} : vector<8x256xf32>, vector<256x256xf32>, vector<8x256xf32> -> vector<8x256xf32>
    %c0_9 = arith.constant 0 : index
    %c0_10 = arith.constant 0 : index
    %10 = vector.load %arg5[%c0_9, %c0_10] : memref<1x256xf32, #tpu.memory_space<vmem>>, vector<1x256xf32>
    %11 = vector.broadcast %10 : vector<1x256xf32> to vector<8x256xf32>
    %12 = arith.addf %9, %11 : vector<8x256xf32>
    %cst_11 = arith.constant 0.000000e+00 : f32
    %13 = vector.broadcast %cst_11 : f32 to vector<8x256xf32>
    %14 = arith.maximumf %12, %13 : vector<8x256xf32>
    %c0_12 = arith.constant 0 : index
    %c0_13 = arith.constant 0 : index
    %15 = vector.load %arg6[%c0_12, %c0_13] : memref<256x256xf32, #tpu.memory_space<vmem>>, vector<256x256xf32>
    %cst_14 = arith.constant dense<0.000000e+00> : vector<8x256xf32>
    %16 = tpu.matmul %14, %15, %cst_14 {dimension_numbers = #tpu.dot_dimension_numbers<[1], [0], [0], [1], [0, 0, 1, 1], [], []>} : vector<8x256xf32>, vector<256x256xf32>, vector<8x256xf32> -> vector<8x256xf32>
    %c0_15 = arith.constant 0 : index
    %c0_16 = arith.constant 0 : index
    %17 = vector.load %arg7[%c0_15, %c0_16] : memref<1x256xf32, #tpu.memory_space<vmem>>, vector<1x256xf32>
    %18 = vector.broadcast %17 : vector<1x256xf32> to vector<8x256xf32>
    %19 = arith.addf %16, %18 : vector<8x256xf32>
    %cst_17 = arith.constant 0.000000e+00 : f32
    %20 = vector.broadcast %cst_17 : f32 to vector<8x256xf32>
    %21 = arith.maximumf %19, %20 : vector<8x256xf32>
    %c0_18 = arith.constant 0 : index
    %c0_19 = arith.constant 0 : index
    %22 = vector.load %arg8[%c0_18, %c0_19] : memref<256x4xf32, #tpu.memory_space<vmem>>, vector<256x4xf32>
    %cst_20 = arith.constant dense<0.000000e+00> : vector<8x4xf32>
    %23 = tpu.matmul %21, %22, %cst_20 {dimension_numbers = #tpu.dot_dimension_numbers<[1], [0], [0], [1], [0, 0, 1, 1], [], []>} : vector<8x256xf32>, vector<256x4xf32>, vector<8x4xf32> -> vector<8x4xf32>
    %c0_21 = arith.constant 0 : index
    %c0_22 = arith.constant 0 : index
    %24 = vector.load %arg9[%c0_21, %c0_22] : memref<1x4xf32, #tpu.memory_space<vmem>>, vector<1x4xf32>
    %25 = vector.broadcast %24 : vector<1x4xf32> to vector<8x4xf32>
    %26 = arith.addf %23, %25 : vector<8x4xf32>
    %c0_23 = arith.constant 0 : index
    %c0_24 = arith.constant 0 : index
    %27 = vector.load %arg10[%c0_23, %c0_24] : memref<8x4xf32, #tpu.memory_space<vmem>>, vector<8x4xf32>
    tpu.vector_store %arg10[%c0_23, %c0_24], %26 {strides = array<i32>} : memref<8x4xf32, #tpu.memory_space<vmem>>, vector<8x4xf32>,
    return
  }
  func.func @transform_0(%arg0: i32) -> (i32, i32) {
    %c0_i32 = arith.constant 0 : i32
    %c0_i32_0 = arith.constant 0 : i32
    return %arg0, %c0_i32 : i32, i32
  }
  func.func @transform_1(%arg0: i32) -> (i32, i32) {
    %c0_i32 = arith.constant 0 : i32
    %c0_i32_0 = arith.constant 0 : i32
    %c0_i32_1 = arith.constant 0 : i32
    return %c0_i32, %c0_i32_0 : i32, i32
  }
  func.func @transform_2(%arg0: i32) -> (i32, i32) {
    %c0_i32 = arith.constant 0 : i32
    %c0_i32_0 = arith.constant 0 : i32
    %c0_i32_1 = arith.constant 0 : i32
    return %c0_i32, %c0_i32_0 : i32, i32
  }
  func.func @transform_3(%arg0: i32) -> (i32, i32) {
    %c0_i32 = arith.constant 0 : i32
    %c0_i32_0 = arith.constant 0 : i32
    %c0_i32_1 = arith.constant 0 : i32
    return %c0_i32, %c0_i32_0 : i32, i32
  }
  func.func @transform_4(%arg0: i32) -> (i32, i32) {
    %c0_i32 = arith.constant 0 : i32
    %c0_i32_0 = arith.constant 0 : i32
    %c0_i32_1 = arith.constant 0 : i32
    return %c0_i32, %c0_i32_0 : i32, i32
  }
  func.func @transform_5(%arg0: i32) -> (i32, i32) {
    %c0_i32 = arith.constant 0 : i32
    %c0_i32_0 = arith.constant 0 : i32
    %c0_i32_1 = arith.constant 0 : i32
    return %c0_i32, %c0_i32_0 : i32, i32
  }
  func.func @transform_6(%arg0: i32) -> (i32, i32) {
    %c0_i32 = arith.constant 0 : i32
    %c0_i32_0 = arith.constant 0 : i32
    %c0_i32_1 = arith.constant 0 : i32
    return %c0_i32, %c0_i32_0 : i32, i32
  }
  func.func @transform_7(%arg0: i32) -> (i32, i32) {
    %c0_i32 = arith.constant 0 : i32
    %c0_i32_0 = arith.constant 0 : i32
    %c0_i32_1 = arith.constant 0 : i32
    return %c0_i32, %c0_i32_0 : i32, i32
  }
  func.func @transform_8(%arg0: i32) -> (i32, i32) {
    %c0_i32 = arith.constant 0 : i32
    %c0_i32_0 = arith.constant 0 : i32
    %c0_i32_1 = arith.constant 0 : i32
    return %c0_i32, %c0_i32_0 : i32, i32
  }
  func.func @transform_9(%arg0: i32) -> (i32, i32) {
    %c0_i32 = arith.constant 0 : i32
    %c0_i32_0 = arith.constant 0 : i32
    return %arg0, %c0_i32 : i32, i32
  }
}

</mosaic_0001>

<bundles_post_ra>
// kernel: tpu_custom_call.1
= control target key start
LH: loop header
LB: loop body
LE: loop exit
PB: predicated region body
PF: predicated region fallthrough
CT: control target
= control target key end

     0   :  { %14 = vsyncpa [#allocation3], 0  ;;  %s1026_s0 = inlined_call_operand.vmem [shape: f32[8,8], index: 0, kind: input, shape index: {}]   ;;  %s1027_s1 = inlined_call_operand.vmem [shape: f32[8,256], index: 1, kind: input, shape index: {}]   ;;  %s1028_s2 = inlined_call_operand.vmem [shape: f32[1,256], index: 2, kind: input, shape index: {}]   ;;  %s1029_s3 = inlined_call_operand.hbm [shape: f32[256,256], index: 3, kind: input, shape index: {}]   ;;  %s1030_s4 = inlined_call_operand.vmem [shape: f32[1,256], index: 4, kind: input, shape index: {}]   ;;  %s1031_s5 = inlined_call_operand.hbm [shape: f32[256,256], index: 5, kind: input, shape index: {}]   ;;  %s1032_s6 = inlined_call_operand.vmem [shape: f32[1,256], index: 6, kind: input, shape index: {}]   ;;  %s1033_s7 = inlined_call_operand.vmem [shape: f32[256,4], index: 7, kind: input, shape index: {}]   ;;  %s1034_s8 = inlined_call_operand.vmem [shape: f32[1,4], index: 8, kind: input, shape index: {}]   ;;  %s1035_s9 = inlined_call_operand.vmem [shape: f32[8,4], index: 9, kind: output, shape index: {}]  }
   0x1   :  { %15 = vsyncpa [#allocation5], 0  ;;  %s817_s30 = smov [#allocation2]   ;;  %s769_s13 = scalar_lea.hbm %s1029_s3, 8192 }
   0x2   :  { %s27_s10 = sshll.u32 %s817_s30, 4  ;;  %p770_p0 = scmp.ne.s32.totalorder %s1029_s3, %s769_s13  ;;  %s28_s10 = int_to_ptr.vmem [resolvable:$true] %s27_s10 }
   0x3   :  { %p773_p1 = scmp.lt.u32.totalorder %s769_s13, %s1029_s3 }
   0x5   :  { %p775_p2 = pnand %p773_p1, %p770_p0 }
   0x7   :  { %778 = shalt.err (!%p775_p2)
}
   0x8   :  { %s779_s18 = scalar_lea.vmem %s28_s10, 8192  ;;  %p784_p4 = scmp.lt.s32.totalorder %s28_s10, %s28_s10 }
   0x9   :  { %p780_p3 = scmp.ne.s32.totalorder %s28_s10, %s779_s18  ;;  %p785_p5 = scmp.lt.s32.totalorder %s779_s18, %s779_s18 }
   0xb   :  { %p786_p6 = por %p785_p5, %p784_p4 }
   0xd   :  { %p787_p7 = pnand %p786_p6, %p780_p3 }
   0xf   :  { %790 = shalt.err (!%p787_p7)
}
  0x10   :  { %s818_s19 = smov 256   ;;  %s819_s20 = smov 16  }
  0x11   :  { %33 = dma.hbm_to_vmem [thread:$0]  %s1029_s3, 8192, %s28_s10, [#allocation3], %s818_s19, %s818_s19, %s819_s20  }
  0x12   :  { %s820_s23 = smov [#allocation4]   ;;  %s791_s27 = scalar_lea.hbm %s1031_s5, 8192 }
  0x13   :  { %s41_s24 = sshll.u32 %s820_s23, 4  ;;  %p792_p8 = scmp.ne.s32.totalorder %s1031_s5, %s791_s27  ;;  %s42_s24 = int_to_ptr.vmem [resolvable:$true] %s41_s24 }
  0x14   :  { %p795_p9 = scmp.lt.u32.totalorder %s791_s27, %s1031_s5 }
  0x16   :  { %p797_p10 = pnand %p795_p9, %p792_p8 }
  0x18   :  { %800 = shalt.err (!%p797_p10)
}
  0x19   :  { %s801_s12 = scalar_lea.vmem %s42_s24, 8192  ;;  %p806_p12 = scmp.lt.s32.totalorder %s42_s24, %s42_s24 }
  0x1a   :  { %p802_p11 = scmp.ne.s32.totalorder %s42_s24, %s801_s12  ;;  %p807_p13 = scmp.lt.s32.totalorder %s801_s12, %s801_s12 }
  0x1c   :  { %p808_p0 = por %p807_p13, %p806_p12 }
  0x1e   :  { %p809_p1 = pnand %p808_p0, %p802_p11 }
  0x20   :  { %812 = shalt.err (!%p809_p1)
}
  0x21   :  { %47 = dma.hbm_to_vmem [thread:$0]  %s1031_s5, 8192, %s42_s24, [#allocation5], %s818_s19, %s818_s19, %s819_s20  }
  0x22   :  { %813 = dma.done.wait [#allocation3], 8192  }
  0x23   :  { %814 = vsyncadd [#allocation3], 4294959104 }
  0x24   :  { %815 = dma.done.wait [#allocation5], 8192  }
  0x25   :  { %816 = vsyncadd [#allocation5], 4294959104  ;;  %v821_v0 = vmov 0.0   ;;  %v62_v1 = vld [vmem:[%s1027_s1 + $0x8] sm:$0xff]  ;;  %v61_v2 = vld [vmem:[%s1027_s1] sm:$0xff]  ;;  %vm75_vm0 = vcmask 64512  }
  0x26   :  { %143 = vmatprep.mubr.f32.mxu0 %v821_v0  ;;  %v60_v3 = vld [vmem:[%s1026_s0] sm:$0xff]  ;;  %79 = vmatprep.subr.mxu0 %v62_v1  ;;  %v153_v4 = vld [vmem:[#allocation2 + $0x8] sm:$0xff]  ;;  %v155_v5 = vld [vmem:[#allocation2 + $0x18] sm:$0xff]  ;;  %vm559_vm1 = vcmask 31744  }
  0x27   :  { %v152_v6 = vld [vmem:[#allocation2] sm:$0xff]  ;;  %80 = vmatpush1.msra.mxu0 %v61_v2  ;;  %v604_v7 = vpack.c.bf16 %v155_v5, %v153_v4  ;;  %v154_v8 = vld [vmem:[#allocation2 + $0x10] sm:$0xff]  ;;  %v157_v9 = vld [vmem:[#allocation2 + $0x28] sm:$0xff] }
  0x28   :  { %v159_v10 = vld [vmem:[#allocation2 + $0x38] sm:$0xff]  ;;  %567 = vmatmul.mubr.msk.f32.vlgmr.msra.gmra.mrb[0].mxu0 %vm75_vm0, %v60_v3  ;;  %v606_v11 = vpack.c.bf16 %v154_v8, %v152_v6  ;;  %v156_v13 = vld [vmem:[#allocation2 + $0x20] sm:$0xff]  ;;  %v158_v14 = vld [vmem:[#allocation2 + $0x30] sm:$0xff] }
  0x29   :  { %v608_v12 = vpack.c.bf16 %v159_v10, %v157_v9  ;;  %v161_v15 = vld [vmem:[#allocation2 + $0x48] sm:$0xff]  ;;  %605 = vmatprep.subr.bf16.mxu1 %v604_v7  ;;  %v163_v16 = vld [vmem:[#allocation2 + $0x58] sm:$0xff]  ;;  %v610_v17 = vpack.c.bf16 %v158_v14, %v156_v13  ;;  %v160_v19 = vld [vmem:[#allocation2 + $0x40] sm:$0xff] }
  0x2a   :  { %607 = vmatpush1.bf16.msra.mxu1 %v606_v11  ;;  %v612_v18 = vpack.c.bf16 %v163_v16, %v161_v15  ;;  %v162_v20 = vld [vmem:[#allocation2 + $0x50] sm:$0xff]  ;;  %v165_v21 = vld [vmem:[#allocation2 + $0x68] sm:$0xff]  ;;  %v167_v22 = vld [vmem:[#allocation2 + $0x78] sm:$0xff] }
  0x2b   :  { %609 = vmatprep.subr.bf16.mxu1 %v608_v12  ;;  %v614_v23 = vpack.c.bf16 %v162_v20, %v160_v19  ;;  %v616_v24 = vpack.c.bf16 %v167_v22, %v165_v21  ;;  %v164_v25 = vld [vmem:[#allocation2 + $0x60] sm:$0xff]  ;;  %v166_v26 = vld [vmem:[#allocation2 + $0x70] sm:$0xff]  ;;  %v169_v27 = vld [vmem:[#allocation2 + $0x88] sm:$0xff] }
  0x2c   :  { %v171_v28 = vld [vmem:[#allocation2 + $0x98] sm:$0xff]  ;;  %v618_v29 = vpack.c.bf16 %v166_v26, %v164_v25  ;;  %v168_v31 = vld [vmem:[#allocation2 + $0x80] sm:$0xff]  ;;  %v170_v32 = vld [vmem:[#allocation2 + $0x90] sm:$0xff] }
  0x2d   :  { %v620_v30 = vpack.c.bf16 %v171_v28, %v169_v27  ;;  %v173_v33 = vld [vmem:[#allocation2 + $0xa8] sm:$0xff]  ;;  %v175_v34 = vld [vmem:[#allocation2 + $0xb8] sm:$0xff]  ;;  %v622_v35 = vpack.c.bf16 %v170_v32, %v168_v31  ;;  %v172_v37 = vld [vmem:[#allocation2 + $0xa0] sm:$0xff] }
  0x2e   :  { %611 = vmatpush1.bf16.msra.mxu1 %v610_v17  ;;  %v624_v36 = vpack.c.bf16 %v175_v34, %v173_v33  ;;  %v174_v38 = vld [vmem:[#allocation2 + $0xb0] sm:$0xff]  ;;  %v177_v39 = vld [vmem:[#allocation2 + $0xc8] sm:$0xff]  ;;  %v179_v40 = vld [vmem:[#allocation2 + $0xd8] sm:$0xff] }
  0x2f   :  { %613 = vmatprep.subr.bf16.mxu1 %v612_v18  ;;  %v626_v41 = vpack.c.bf16 %v174_v38, %v172_v37  ;;  %v628_v42 = vpack.c.bf16 %v179_v40, %v177_v39  ;;  %v176_v43 = vld [vmem:[#allocation2 + $0xc0] sm:$0xff]  ;;  %v178_v44 = vld [vmem:[#allocation2 + $0xd0] sm:$0xff]  ;;  %v181_v45 = vld [vmem:[#allocation2 + $0xe8] sm:$0xff] }
  0x30   :  { %v183_v46 = vld [vmem:[#allocation2 + $0xf8] sm:$0xff]  ;;  %v630_v47 = vpack.c.bf16 %v178_v44, %v176_v43  ;;  %v180_v49 = vld [vmem:[#allocation2 + $0xe0] sm:$0xff]  ;;  %v182_v50 = vld [vmem:[#allocation2 + $0xf0] sm:$0xff] }
  0x31   :  { %v632_v48 = vpack.c.bf16 %v183_v46, %v181_v45  ;;  %v185_v51 = vld [vmem:[#allocation2 + $0x108] sm:$0xff]  ;;  %v187_v52 = vld [vmem:[#allocation2 + $0x118] sm:$0xff]  ;;  %v634_v53 = vpack.c.bf16 %v182_v50, %v180_v49  ;;  %v184_v55 = vld [vmem:[#allocation2 + $0x100] sm:$0xff] }
  0x32   :  { %615 = vmatpush1.bf16.msra.mxu1 %v614_v23  ;;  %v636_v54 = vpack.c.bf16 %v187_v52, %v185_v51  ;;  %v186_v56 = vld [vmem:[#allocation2 + $0x110] sm:$0xff]  ;;  %v189_v57 = vld [vmem:[#allocation2 + $0x128] sm:$0xff]  ;;  %v191_v58 = vld [vmem:[#allocation2 + $0x138] sm:$0xff] }
  0x33   :  { %617 = vmatprep.subr.bf16.mxu1 %v616_v24  ;;  %v638_v59 = vpack.c.bf16 %v186_v56, %v184_v55  ;;  %v640_v60 = vpack.c.bf16 %v191_v58, %v189_v57  ;;  %v188_v61 = vld [vmem:[#allocation2 + $0x120] sm:$0xff]  ;;  %v190_v62 = vld [vmem:[#allocation2 + $0x130] sm:$0xff]  ;;  %v193_v63 = vld [vmem:[#allocation2 + $0x148] sm:$0xff] }
  0x34   :  { %v195_v0 = vld [vmem:[#allocation2 + $0x158] sm:$0xff]  ;;  %v642_v1 = vpack.c.bf16 %v190_v62, %v188_v61  ;;  %v192_v3 = vld [vmem:[#allocation2 + $0x140] sm:$0xff]  ;;  %v194_v4 = vld [vmem:[#allocation2 + $0x150] sm:$0xff] }
  0x35   :  { %v644_v2 = vpack.c.bf16 %v195_v0, %v193_v63  ;;  %v197_v5 = vld [vmem:[#allocation2 + $0x168] sm:$0xff]  ;;  %v199_v6 = vld [vmem:[#allocation2 + $0x178] sm:$0xff]  ;;  %v646_v7 = vpack.c.bf16 %v194_v4, %v192_v3  ;;  %v196_v9 = vld [vmem:[#allocation2 + $0x160] sm:$0xff] }
  0x36   :  { %619 = vmatpush1.bf16.msra.mxu1 %v618_v29  ;;  %v648_v8 = vpack.c.bf16 %v199_v6, %v197_v5  ;;  %v198_v10 = vld [vmem:[#allocation2 + $0x170] sm:$0xff]  ;;  %v201_v11 = vld [vmem:[#allocation2 + $0x188] sm:$0xff]  ;;  %v203_v12 = vld [vmem:[#allocation2 + $0x198] sm:$0xff] }
  0x37   :  { %621 = vmatprep.subr.bf16.mxu1 %v620_v30  ;;  %v650_v13 = vpack.c.bf16 %v198_v10, %v196_v9  ;;  %v652_v14 = vpack.c.bf16 %v203_v12, %v201_v11  ;;  %v200_v15 = vld [vmem:[#allocation2 + $0x180] sm:$0xff]  ;;  %v202_v16 = vld [vmem:[#allocation2 + $0x190] sm:$0xff]  ;;  %v205_v17 = vld [vmem:[#allocation2 + $0x1a8] sm:$0xff] }
  0x38   :  { %v207_v18 = vld [vmem:[#allocation2 + $0x1b8] sm:$0xff]  ;;  %v654_v19 = vpack.c.bf16 %v202_v16, %v200_v15  ;;  %v204_v21 = vld [vmem:[#allocation2 + $0x1a0] sm:$0xff]  ;;  %v206_v22 = vld [vmem:[#allocation2 + $0x1b0] sm:$0xff] }
  0x39   :  { %v656_v20 = vpack.c.bf16 %v207_v18, %v205_v17  ;;  %v209_v23 = vld [vmem:[#allocation2 + $0x1c8] sm:$0xff]  ;;  %v211_v24 = vld [vmem:[#allocation2 + $0x1d8] sm:$0xff]  ;;  %v658_v25 = vpack.c.bf16 %v206_v22, %v204_v21  ;;  %v208_v27 = vld [vmem:[#allocation2 + $0x1c0] sm:$0xff] }
  0x3a   :  { %623 = vmatpush1.bf16.msra.mxu1 %v622_v35  ;;  %v660_v26 = vpack.c.bf16 %v211_v24, %v209_v23  ;;  %v210_v28 = vld [vmem:[#allocation2 + $0x1d0] sm:$0xff]  ;;  %v213_v30 = vld [vmem:[#allocation2 + $0x1e8] sm:$0xff]  ;;  %v215_v31 = vld [vmem:[#allocation2 + $0x1f8] sm:$0xff] }
  0x3b   :  { %625 = vmatprep.subr.bf16.mxu1 %v624_v36  ;;  %v662_v29 = vpack.c.bf16 %v210_v28, %v208_v27  ;;  %v664_v32 = vpack.c.bf16 %v215_v31, %v213_v30  ;;  %v212_v33 = vld [vmem:[#allocation2 + $0x1e0] sm:$0xff]  ;;  %v214_v34 = vld [vmem:[#allocation2 + $0x1f0] sm:$0xff]  ;;  %v302_v36 = vld [vmem:[#allocation4 + $0x8] sm:$0xff] }
  0x3c   :  { %v666_v35 = vpack.c.bf16 %v214_v34, %v212_v33  ;;  %v304_v37 = vld [vmem:[#allocation4 + $0x18] sm:$0xff]  ;;  %v301_v38 = vld [vmem:[#allocation4] sm:$0xff]  ;;  %v303_v40 = vld [vmem:[#allocation4 + $0x10] sm:$0xff] }
  0x3d   :  { %v668_v39 = vpack.c.bf16 %v304_v37, %v302_v36  ;;  %v670_v43 = vpack.c.bf16 %v303_v40, %v301_v38  ;;  %v305_v45 = vld [vmem:[#allocation4 + $0x20] sm:$0xff]  ;;  %v307_v46 = vld [vmem:[#allocation4 + $0x30] sm:$0xff]  ;;  %v342_v31 = vld [vmem:[#allocation4 + $0x148] sm:$0xff] }
  0x3e   :  { %627 = vmatpush1.bf16.msra.mxu1 %v626_v41  ;;  %v306_v41 = vld [vmem:[#allocation4 + $0x28] sm:$0xff]  ;;  %v674_v49 = vpack.c.bf16 %v307_v46, %v305_v45  ;;  %v309_v51 = vld [vmem:[#allocation4 + $0x40] sm:$0xff]  ;;  %v311_v52 = vld [vmem:[#allocation4 + $0x50] sm:$0xff] }
  0x3f   :  { %629 = vmatprep.subr.bf16.mxu1 %v628_v42  ;;  %v308_v42 = vld [vmem:[#allocation4 + $0x38] sm:$0xff]  ;;  %669 = vmatprep.subr.bf16.mxu0 %v668_v39  ;;  %v678_v55 = vpack.c.bf16 %v311_v52, %v309_v51  ;;  %v313_v57 = vld [vmem:[#allocation4 + $0x60] sm:$0xff]  ;;  %v315_v58 = vld [vmem:[#allocation4 + $0x70] sm:$0xff] }
  0x40   :  { %v672_v44 = vpack.c.bf16 %v308_v42, %v306_v41  ;;  %671 = vmatpush1.bf16.msra.mxu0 %v670_v43  ;;  %v682_v61 = vpack.c.bf16 %v315_v58, %v313_v57  ;;  %v317_v63 = vld [vmem:[#allocation4 + $0x80] sm:$0xff]  ;;  %v319_v0 = vld [vmem:[#allocation4 + $0x90] sm:$0xff]  ;;  %v346_v37 = vld [vmem:[#allocation4 + $0x168] sm:$0xff] }
  0x41   :  { %v686_v3 = vpack.c.bf16 %v319_v0, %v317_v63  ;;  %v321_v5 = vld [vmem:[#allocation4 + $0xa0] sm:$0xff]  ;;  %v323_v6 = vld [vmem:[#allocation4 + $0xb0] sm:$0xff]  ;;  %v348_v38 = vld [vmem:[#allocation4 + $0x178] sm:$0xff] }
  0x42   :  { %631 = vmatpush1.bf16.msra.mxu1 %v630_v47  ;;  %v310_v47 = vld [vmem:[#allocation4 + $0x48] sm:$0xff]  ;;  %673 = vmatprep.subr.bf16.mxu0 %v672_v44  ;;  %v690_v9 = vpack.c.bf16 %v323_v6, %v321_v5  ;;  %v325_v11 = vld [vmem:[#allocation4 + $0xc0] sm:$0xff]  ;;  %v327_v12 = vld [vmem:[#allocation4 + $0xd0] sm:$0xff]  ;;  %v712_v40 = vpack.c.bf16 %v348_v38, %v346_v37 }
  0x43   :  { %633 = vmatprep.subr.bf16.mxu1 %v632_v48  ;;  %v312_v48 = vld [vmem:[#allocation4 + $0x58] sm:$0xff]  ;;  %v694_v15 = vpack.c.bf16 %v327_v12, %v325_v11  ;;  %v329_v17 = vld [vmem:[#allocation4 + $0xe0] sm:$0xff]  ;;  %v331_v18 = vld [vmem:[#allocation4 + $0xf0] sm:$0xff] }
  0x44   :  { %v676_v50 = vpack.c.bf16 %v312_v48, %v310_v47  ;;  %675 = vmatpush1.bf16.msra.mxu0 %v674_v49  ;;  %v698_v21 = vpack.c.bf16 %v331_v18, %v329_v17  ;;  %v333_v23 = vld [vmem:[#allocation4 + $0x100] sm:$0xff]  ;;  %v335_v24 = vld [vmem:[#allocation4 + $0x110] sm:$0xff]  ;;  %v350_v43 = vld [vmem:[#allocation4 + $0x188] sm:$0xff] }
  0x45   :  { %v702_v27 = vpack.c.bf16 %v335_v24, %v333_v23  ;;  %v339_v30 = vld [vmem:[#allocation4 + $0x130] sm:$0xff]  ;;  %v345_v41 = vld [vmem:[#allocation4 + $0x160] sm:$0xff]  ;;  %v352_v44 = vld [vmem:[#allocation4 + $0x198] sm:$0xff] }
  0x46   :  { %635 = vmatpush1.bf16.msra.mxu1 %v634_v53  ;;  %v314_v53 = vld [vmem:[#allocation4 + $0x68] sm:$0xff]  ;;  %677 = vmatprep.subr.bf16.mxu0 %v676_v50  ;;  %v343_v36 = vld [vmem:[#allocation4 + $0x150] sm:$0xff]  ;;  %v716_v46 = vpack.c.bf16 %v352_v44, %v350_v43  ;;  %v349_v47 = vld [vmem:[#allocation4 + $0x180] sm:$0xff] }
  0x47   :  { %637 = vmatprep.subr.bf16.mxu1 %v636_v54  ;;  %v316_v54 = vld [vmem:[#allocation4 + $0x78] sm:$0xff]  ;;  %v347_v42 = vld [vmem:[#allocation4 + $0x170] sm:$0xff]  ;;  %v354_v49 = vld [vmem:[#allocation4 + $0x1a8] sm:$0xff] }
  0x48   :  { %v680_v56 = vpack.c.bf16 %v316_v54, %v314_v53  ;;  %679 = vmatpush1.bf16.msra.mxu0 %v678_v55  ;;  %v714_v45 = vpack.c.bf16 %v347_v42, %v345_v41  ;;  %v351_v48 = vld [vmem:[#allocation4 + $0x190] sm:$0xff]  ;;  %v356_v50 = vld [vmem:[#allocation4 + $0x1b8] sm:$0xff]  ;;  %v353_v53 = vld [vmem:[#allocation4 + $0x1a0] sm:$0xff] }
  0x49   :  { %v718_v51 = vpack.c.bf16 %v351_v48, %v349_v47  ;;  %v720_v52 = vpack.c.bf16 %v356_v50, %v354_v49  ;;  %v355_v54 = vld [vmem:[#allocation4 + $0x1b0] sm:$0xff]  ;;  %v358_v55 = vld [vmem:[#allocation4 + $0x1c8] sm:$0xff]  ;;  %v364_v12 = vld [vmem:[#allocation4 + $0x1f8] sm:$0xff] }
  0x4a   :  { %639 = vmatpush1.bf16.msra.mxu1 %v638_v59  ;;  %v318_v59 = vld [vmem:[#allocation4 + $0x88] sm:$0xff]  ;;  %681 = vmatprep.subr.bf16.mxu0 %v680_v56  ;;  %v360_v56 = vld [vmem:[#allocation4 + $0x1d8] sm:$0xff]  ;;  %v722_v57 = vpack.c.bf16 %v355_v54, %v353_v53  ;;  %v466_v17 = vld [vmem:[%s1033_s7 + $0x80] sm:$0xff] }
  0x4b   :  { %641 = vmatprep.subr.bf16.mxu1 %v640_v60  ;;  %v320_v60 = vld [vmem:[#allocation4 + $0x98] sm:$0xff]  ;;  %v724_v58 = vpack.c.bf16 %v360_v56, %v358_v55  ;;  %v362_v11 = vld [vmem:[#allocation4 + $0x1e8] sm:$0xff]  ;;  %v456_v38 = vld [vmem:[%s1033_s7 + $0x30] sm:$0xff] }
  0x4c   :  { %v684_v62 = vpack.c.bf16 %v320_v60, %v318_v59  ;;  %683 = vmatpush1.bf16.msra.mxu0 %v682_v61  ;;  %v65_v59 = vlaneseq  ;;  %v467_v18 = vld [vmem:[%s1033_s7 + $0x88] sm:$0xff]  ;;  %v469_v23 = vld [vmem:[%s1033_s7 + $0x98] sm:$0xff]  ;;  %v458_v44 = vld [vmem:[%s1033_s7 + $0x40] sm:$0xff] }
  0x4d   :  { %v475_v41 = vld [vmem:[%s1033_s7 + $0xc8] sm:$0xff]  ;;  %v477_v47 = vld [vmem:[%s1033_s7 + $0xd8] sm:$0xff]  ;;  %v460_v50 = vld [vmem:[%s1033_s7 + $0x50] sm:$0xff] }
  0x4e   :  { %643 = vmatpush1.bf16.msra.mxu1 %v642_v1  ;;  %v322_v1 = vld [vmem:[#allocation4 + $0xa8] sm:$0xff]  ;;  %685 = vmatprep.subr.bf16.mxu0 %v684_v62  ;;  %v66_v60 = vshrl.u32 %v65_v59, 7  ;;  %v63_v62 = vld [vmem:[%s1028_s2] sm:$0x3] }
  0x4f   :  { %645 = vmatprep.subr.bf16.mxu1 %v644_v2  ;;  %v324_v2 = vld [vmem:[#allocation4 + $0xb8] sm:$0xff]  ;;  %v479_v53 = vld [vmem:[%s1033_s7 + $0xe8] sm:$0xff]  ;;  %v216_v56 = vld [vmem:[%s1030_s4] sm:$0x3] }
  0x50   :  { %v688_v4 = vpack.c.bf16 %v324_v2, %v322_v1  ;;  %687 = vmatpush1.bf16.msra.mxu0 %v686_v3  ;;  %v905_v61 = vsub.s32 0, %v66_v60  ;;  %v910_v63 = vsub.s32 1, %v66_v60 }
  0x52   :  { %647 = vmatpush1.bf16.msra.mxu1 %v646_v7  ;;  %v326_v7 = vld [vmem:[#allocation4 + $0xc8] sm:$0xff]  ;;  %689 = vmatprep.subr.bf16.mxu0 %v688_v4  ;;  %v68_v0 = vrot.slane %v63_v62, %v905_v61  ;;  %v72_v1 = vrot.slane %v63_v62, %v910_v63 }
  0x53   :  { %649 = vmatprep.subr.bf16.mxu1 %v648_v8  ;;  %v328_v8 = vld [vmem:[#allocation4 + $0xd8] sm:$0xff] }
  0x54   :  { %v692_v10 = vpack.c.bf16 %v328_v8, %v326_v7  ;;  %691 = vmatpush1.bf16.msra.mxu0 %v690_v9  ;;  %v357_v8 = vld [vmem:[#allocation4 + $0x1c0] sm:$0xff]  ;;  %v359_v9 = vld [vmem:[#allocation4 + $0x1d0] sm:$0xff] }
  0x56   :  { %651 = vmatpush1.bf16.msra.mxu1 %v650_v13  ;;  %v330_v13 = vld [vmem:[#allocation4 + $0xe8] sm:$0xff]  ;;  %693 = vmatprep.subr.bf16.mxu0 %v692_v10  ;;  %v726_v10 = vpack.c.bf16 %v359_v9, %v357_v8  ;;  %v464_v9 = vld [vmem:[%s1033_s7 + $0x70] sm:$0xff] }
  0x57   :  { %653 = vmatprep.subr.bf16.mxu1 %v652_v14  ;;  %v332_v14 = vld [vmem:[#allocation4 + $0xf8] sm:$0xff] }
  0x58   :  { %v696_v16 = vpack.c.bf16 %v332_v14, %v330_v13  ;;  %695 = vmatpush1.bf16.msra.mxu0 %v694_v15  ;;  %v728_v13 = vpack.c.bf16 %v364_v12, %v362_v11  ;;  %v361_v14 = vld [vmem:[#allocation4 + $0x1e0] sm:$0xff]  ;;  %v363_v15 = vld [vmem:[#allocation4 + $0x1f0] sm:$0xff] }
  0x59   :  { %v365_v12 = vld [vmem:[%s1032_s6] sm:$0x3] }
  0x5a   :  { %655 = vmatpush1.bf16.msra.mxu1 %v654_v19  ;;  %v334_v19 = vld [vmem:[#allocation4 + $0x108] sm:$0xff]  ;;  %697 = vmatprep.subr.bf16.mxu0 %v696_v16  ;;  %v730_v16 = vpack.c.bf16 %v363_v15, %v361_v14  ;;  %v374_v14 = vrot.slane %v365_v12, %v910_v63 }
  0x5b   :  { %657 = vmatprep.subr.bf16.mxu1 %v656_v20  ;;  %v336_v20 = vld [vmem:[#allocation4 + $0x118] sm:$0xff] }
  0x5c   :  { %v700_v22 = vpack.c.bf16 %v336_v20, %v334_v19  ;;  %699 = vmatpush1.bf16.msra.mxu0 %v698_v21  ;;  %v450_v19 = vld [vmem:[%s1033_s7] sm:$0xff]  ;;  %v732_v20 = vpack.c.bf16 %v467_v18, %v466_v17  ;;  %v451_v21 = vld [vmem:[%s1033_s7 + $0x8] sm:$0xff] }
  0x5d   :  { %v734_v24 = vpack.c.bf16 %v451_v21, %v450_v19 }
  0x5e   :  { %659 = vmatpush1.bf16.msra.mxu1 %v658_v25  ;;  %v338_v25 = vld [vmem:[#allocation4 + $0x128] sm:$0xff]  ;;  %701 = vmatprep.subr.bf16.mxu0 %v700_v22  ;;  %v468_v22 = vld [vmem:[%s1033_s7 + $0x90] sm:$0xff] }
  0x5f   :  { %661 = vmatprep.subr.bf16.mxu1 %v660_v26  ;;  %v340_v26 = vld [vmem:[#allocation4 + $0x138] sm:$0xff] }
  0x60   :  { %v704_v28 = vpack.c.bf16 %v340_v26, %v338_v25  ;;  %703 = vmatpush1.bf16.msra.mxu0 %v702_v27  ;;  %v736_v25 = vpack.c.bf16 %v469_v23, %v468_v22  ;;  %v452_v26 = vld [vmem:[%s1033_s7 + $0x10] sm:$0xff]  ;;  %v453_v27 = vld [vmem:[%s1033_s7 + $0x18] sm:$0xff]  ;;  %v568_v22 = vld [vmem:[%s1034_s8] ss:$0 sm:$0xff] }
  0x62   :  { %663 = vmatpush1.bf16.msra.mxu1 %v662_v29  ;;  %v337_v29 = vld [vmem:[#allocation4 + $0x120] sm:$0xff]  ;;  %705 = vmatprep.subr.bf16.mxu0 %v704_v28 }
  0x63   :  { %665 = vmatprep.subr.bf16.mxu1 %v664_v32  ;;  %v344_v32 = vld [vmem:[#allocation4 + $0x158] sm:$0xff]  ;;  %v706_v33 = vpack.c.bf16 %v339_v30, %v337_v29  ;;  %v470_v28 = vld [vmem:[%s1033_s7 + $0xa0] sm:$0xff]  ;;  %v471_v29 = vld [vmem:[%s1033_s7 + $0xa8] sm:$0xff]  ;;  %v738_v30 = vpack.c.bf16 %v453_v27, %v452_v26 }
  0x64   :  { %v708_v34 = vpack.c.bf16 %v344_v32, %v342_v31  ;;  %v740_v31 = vpack.c.bf16 %v471_v29, %v470_v28  ;;  %v454_v32 = vld [vmem:[%s1033_s7 + $0x20] sm:$0xff] }
  0x65   :  { %707 = vmatpush1.bf16.msra.mxu0 %v706_v33  ;;  %v455_v33 = vld [vmem:[%s1033_s7 + $0x28] sm:$0xff] }
  0x66   :  { %667 = vmatpush1.bf16.msra.mxu1 %v666_v35  ;;  %v341_v35 = vld [vmem:[#allocation4 + $0x140] sm:$0xff]  ;;  %709 = vmatprep.subr.bf16.mxu0 %v708_v34  ;;  %v472_v34 = vld [vmem:[%s1033_s7 + $0xb0] sm:$0xff] }
  0x67   :  { %v710_v39 = vpack.c.bf16 %v343_v36, %v341_v35  ;;  %733 = vmatprep.subr.bf16.mxu1 %v732_v20  ;;  %v473_v35 = vld [vmem:[%s1033_s7 + $0xb8] sm:$0xff]  ;;  %v742_v36 = vpack.c.bf16 %v455_v33, %v454_v32 }
  0x68   :  { %v744_v37 = vpack.c.bf16 %v473_v35, %v472_v34 }
  0x69   :  { %711 = vmatpush1.bf16.msra.mxu0 %v710_v39  ;;  %v457_v39 = vld [vmem:[%s1033_s7 + $0x38] sm:$0xff] }
  0x6a   :  { %713 = vmatprep.subr.bf16.mxu0 %v712_v40  ;;  %v474_v40 = vld [vmem:[%s1033_s7 + $0xc0] sm:$0xff]  ;;  %v746_v42 = vpack.c.bf16 %v457_v39, %v456_v38 }
  0x6b   :  { %v748_v43 = vpack.c.bf16 %v475_v41, %v474_v40 }
  0x6d   :  { %715 = vmatpush1.bf16.msra.mxu0 %v714_v45  ;;  %v459_v45 = vld [vmem:[%s1033_s7 + $0x48] sm:$0xff] }
  0x6e   :  { %717 = vmatprep.subr.bf16.mxu0 %v716_v46  ;;  %v476_v46 = vld [vmem:[%s1033_s7 + $0xd0] sm:$0xff]  ;;  %v750_v48 = vpack.c.bf16 %v459_v45, %v458_v44 }
  0x6f   :  { %v752_v49 = vpack.c.bf16 %v477_v47, %v476_v46 }
  0x71   :  { %719 = vmatpush1.bf16.msra.mxu0 %v718_v51  ;;  %v461_v51 = vld [vmem:[%s1033_s7 + $0x58] sm:$0xff] }
  0x72   :  { %721 = vmatprep.subr.bf16.mxu0 %v720_v52  ;;  %v478_v52 = vld [vmem:[%s1033_s7 + $0xe0] sm:$0xff]  ;;  %v754_v54 = vpack.c.bf16 %v461_v51, %v460_v50 }
  0x73   :  { %v756_v55 = vpack.c.bf16 %v479_v53, %v478_v52 }
  0x75   :  { %723 = vmatpush1.bf16.msra.mxu0 %v722_v57  ;;  %v221_v57 = vrot.slane %v216_v56, %v905_v61 }
  0x76   :  { %725 = vmatprep.subr.bf16.mxu0 %v724_v58  ;;  %v225_v58 = vrot.slane %v216_v56, %v910_v63 }
  0x79   :  { %727 = vmatpush1.bf16.msra.mxu0 %v726_v10  ;;  %v465_v10 = vld [vmem:[%s1033_s7 + $0x78] sm:$0xff] }
  0x7a   :  { %729 = vmatprep.subr.bf16.mxu0 %v728_v13  ;;  %v762_v11 = vpack.c.bf16 %v465_v10, %v464_v9  ;;  %v370_v13 = vrot.slane %v365_v12, %v905_v61 }
  0x7d   :  { %731 = vmatpush1.bf16.msra.mxu0 %v730_v16 }
  0xfb   :  { %v145_v2 = vpop.f32.mrb[0].mxu0 }
  0xfc   :  { %v146_v3 = vadd.f32 %v145_v2, %v68_v0  ;;  %v147_v4 = vpop.f32.mrb[1].mxu0 }
  0xfd   :  { %v148_v5 = vadd.f32 %v147_v4, %v72_v1  ;;  %v463_v4 = vld [vmem:[%s1033_s7 + $0x68] sm:$0xff] }
  0xfe   :  { %v150_v7 = vmax.f32 %v146_v3, 0.0  ;;  %v462_v3 = vld [vmem:[%s1033_s7 + $0x60] sm:$0xff] }
  0xff   :  { %v151_v6 = vmax.f32 %v148_v5, 0.0  ;;  %v758_v5 = vpack.c.bf16 %v463_v4, %v462_v3 }
 0x101   :  { %292 = vmatprep.mubr.f32.mxu1 %v151_v6  ;;  %v480_v6 = vld [vmem:[%s1033_s7 + $0xf0] sm:$0xff] }
 0x102   :  { %293 = vmatmul.mubr.f32.vlgmr.msra.gmra.mrb[0].mxu1 %v150_v7  ;;  %v481_v7 = vld [vmem:[%s1033_s7 + $0xf8] sm:$0xff] }
 0x103   :  { %735 = vmatpush3.bf16.msra.mxu1 %v734_v24  ;;  %v760_v8 = vpack.c.bf16 %v481_v7, %v480_v6 }
 0x104   :  { %737 = vmatprep.subr.bf16.mxu1 %v736_v25 }
 0x107   :  { %739 = vmatpush3.bf16.msra.mxu1 %v738_v30 }
 0x108   :  { %741 = vmatprep.subr.bf16.mxu1 %v740_v31 }
 0x10b   :  { %743 = vmatpush3.bf16.msra.mxu1 %v742_v36 }
 0x10c   :  { %745 = vmatprep.subr.bf16.mxu1 %v744_v37 }
 0x10f   :  { %747 = vmatpush3.bf16.msra.mxu1 %v746_v42 }
 0x110   :  { %749 = vmatprep.subr.bf16.mxu1 %v748_v43 }
 0x113   :  { %751 = vmatpush3.bf16.msra.mxu1 %v750_v48 }
 0x114   :  { %753 = vmatprep.subr.bf16.mxu1 %v752_v49 }
 0x117   :  { %755 = vmatpush3.bf16.msra.mxu1 %v754_v54 }
 0x118   :  { %757 = vmatprep.subr.bf16.mxu1 %v756_v55 }
 0x11b   :  { %759 = vmatpush3.bf16.msra.mxu1 %v758_v5 }
 0x11c   :  { %761 = vmatprep.subr.bf16.mxu1 %v760_v8 }
 0x11f   :  { %763 = vmatpush3.bf16.msra.mxu1 %v762_v11 }
 0x1d5   :  { %v294_v59 = vpop.f32.mrb[0].mxu1 }
 0x1d6   :  { %v295_v60 = vadd.f32 %v294_v59, %v221_v57  ;;  %v296_v62 = vpop.f32.mrb[1].mxu1 }
 0x1d7   :  { %v297_v0 = vadd.f32 %v296_v62, %v225_v58 }
 0x1d8   :  { %v299_v2 = vmax.f32 %v295_v60, 0.0 }
 0x1d9   :  { %v300_v1 = vmax.f32 %v297_v0, 0.0 }
 0x1db   :  { %441 = vmatprep.mubr.f32.mxu0 %v300_v1 }
 0x1dc   :  { %442 = vmatmul.mubr.f32.vlgmr.msra.gmra.mrb[2].mxu0 %v299_v2 }
 0x2af   :  { %v443_v15 = vpop.f32.mrb[2].mxu0 }
 0x2b0   :  { %v444_v16 = vadd.f32 %v443_v15, %v370_v13  ;;  %v445_v17 = vpop.f32.mrb[3].mxu0 }
 0x2b1   :  { %v446_v18 = vadd.f32 %v445_v17, %v374_v14 }
 0x2b2   :  { %v448_v20 = vmax.f32 %v444_v16, 0.0 }
 0x2b3   :  { %v449_v19 = vmax.f32 %v446_v18, 0.0 }
 0x2b5   :  { %553 = vmatprep.mubr.f32.mxu1 %v449_v19 }
 0x2b6   :  { %554 = vmatmul.mubr.f32.vlgmr.msra.gmra.mrb[2].mxu1 %v448_v20 }
 0x389   :  { %v601_v21 = vpop.f32.mrb[2].mxu1 }
 0x38a   :  { %v602_v23 = vpop.f32.mrb[3].mxu1 }
 0x38b   :  { %v603_v24 = vadd.f32 %v602_v23, %v601_v21 }
 0x38d   :  { %v556_v25 = vadd.f32 %v603_v24, %v568_v22 }
 0x38f   :  { %560 = vst.msk [vmem:[%s1035_s9] sm:$0xff] %vm559_vm1, %v556_v25 }
 0x390   :  { %565 = vsyncpa [#allocation3], 1 }
 0x391   :  { %566 = vsyncpa [#allocation5], 1 }

// kernel: tpu_custom_call.1
= control target key start
LH: loop header
LB: loop body
LE: loop exit
PB: predicated region body
PF: predicated region fallthrough
CT: control target
= control target key end

     0   :  { %14 = vsyncpa [#allocation3], 0  ;;  %s1026_s0 = inlined_call_operand.vmem [shape: f32[8,8], index: 0, kind: input, shape index: {}]   ;;  %s1027_s1 = inlined_call_operand.vmem [shape: f32[8,256], index: 1, kind: input, shape index: {}]   ;;  %s1028_s2 = inlined_call_operand.vmem [shape: f32[1,256], index: 2, kind: input, shape index: {}]   ;;  %s1029_s3 = inlined_call_operand.hbm [shape: f32[256,256], index: 3, kind: input, shape index: {}]   ;;  %s1030_s4 = inlined_call_operand.vmem [shape: f32[1,256], index: 4, kind: input, shape index: {}]   ;;  %s1031_s5 = inlined_call_operand.hbm [shape: f32[256,256], index: 5, kind: input, shape index: {}]   ;;  %s1032_s6 = inlined_call_operand.vmem [shape: f32[1,256], index: 6, kind: input, shape index: {}]   ;;  %s1033_s7 = inlined_call_operand.vmem [shape: f32[256,4], index: 7, kind: input, shape index: {}]   ;;  %s1034_s8 = inlined_call_operand.vmem [shape: f32[1,4], index: 8, kind: input, shape index: {}]   ;;  %s1035_s9 = inlined_call_operand.vmem [shape: f32[8,4], index: 9, kind: output, shape index: {}]  }
   0x1   :  { %15 = vsyncpa [#allocation5], 0  ;;  %s817_s30 = smov [#allocation2]   ;;  %s769_s13 = scalar_lea.hbm %s1029_s3, 8192 }
   0x2   :  { %s27_s10 = sshll.u32 %s817_s30, 4  ;;  %p770_p0 = scmp.ne.s32.totalorder %s1029_s3, %s769_s13  ;;  %s28_s10 = int_to_ptr.vmem [resolvable:$true] %s27_s10 }
   0x3   :  { %p773_p1 = scmp.lt.u32.totalorder %s769_s13, %s1029_s3 }
   0x5   :  { %p775_p2 = pnand %p773_p1, %p770_p0 }
   0x7   :  { %778 = shalt.err (!%p775_p2)
}
   0x8   :  { %s779_s18 = scalar_lea.vmem %s28_s10, 8192  ;;  %p784_p4 = scmp.lt.s32.totalorder %s28_s10, %s28_s10 }
   0x9   :  { %p780_p3 = scmp.ne.s32.totalorder %s28_s10, %s779_s18  ;;  %p785_p5 = scmp.lt.s32.totalorder %s779_s18, %s779_s18 }
   0xb   :  { %p786_p6 = por %p785_p5, %p784_p4 }
   0xd   :  { %p787_p7 = pnand %p786_p6, %p780_p3 }
   0xf   :  { %790 = shalt.err (!%p787_p7)
}
  0x10   :  { %s818_s19 = smov 256   ;;  %s819_s20 = smov 16  }
  0x11   :  { %33 = dma.hbm_to_vmem [thread:$0]  %s1029_s3, 8192, %s28_s10, [#allocation3], %s818_s19, %s818_s19, %s819_s20  }
  0x12   :  { %s820_s23 = smov [#allocation4]   ;;  %s791_s27 = scalar_lea.hbm %s1031_s5, 8192 }
  0x13   :  { %s41_s24 = sshll.u32 %s820_s23, 4  ;;  %p792_p8 = scmp.ne.s32.totalorder %s1031_s5, %s791_s27  ;;  %s42_s24 = int_to_ptr.vmem [resolvable:$true] %s41_s24 }
  0x14   :  { %p795_p9 = scmp.lt.u32.totalorder %s791_s27, %s1031_s5 }
  0x16   :  { %p797_p10 = pnand %p795_p9, %p792_p8 }
  0x18   :  { %800 = shalt.err (!%p797_p10)
}
  0x19   :  { %s801_s12 = scalar_lea.vmem %s42_s24, 8192  ;;  %p806_p12 = scmp.lt.s32.totalorder %s42_s24, %s42_s24 }
  0x1a   :  { %p802_p11 = scmp.ne.s32.totalorder %s42_s24, %s801_s12  ;;  %p807_p13 = scmp.lt.s32.totalorder %s801_s12, %s801_s12 }
  0x1c   :  { %p808_p0 = por %p807_p13, %p806_p12 }
  0x1e   :  { %p809_p1 = pnand %p808_p0, %p802_p11 }
  0x20   :  { %812 = shalt.err (!%p809_p1)
}
  0x21   :  { %47 = dma.hbm_to_vmem [thread:$0]  %s1031_s5, 8192, %s42_s24, [#allocation5], %s818_s19, %s818_s19, %s819_s20  }
  0x22   :  { %813 = dma.done.wait [#allocation3], 8192  }
  0x23   :  { %814 = vsyncadd [#allocation3], 4294959104 }
  0x24   :  { %815 = dma.done.wait [#allocation5], 8192  }
  0x25   :  { %816 = vsyncadd [#allocation5], 4294959104  ;;  %v821_v0 = vmov 0.0   ;;  %v62_v1 = vld [vmem:[%s1027_s1 + $0x8] sm:$0xff]  ;;  %v61_v2 = vld [vmem:[%s1027_s1] sm:$0xff]  ;;  %vm75_vm0 = vcmask 64512  }
  0x26   :  { %143 = vmatprep.mubr.f32.mxu0 %v821_v0  ;;  %v60_v3 = vld [vmem:[%s1026_s0] sm:$0xff]  ;;  %79 = vmatprep.subr.mxu0 %v62_v1  ;;  %v153_v4 = vld [vmem:[#allocation2 + $0x8] sm:$0xff]  ;;  %v155_v5 = vld [vmem:[#allocation2 + $0x18] sm:$0xff]  ;;  %vm559_vm1 = vcmask 31744  }
  0x27   :  { %v152_v6 = vld [vmem:[#allocation2] sm:$0xff]  ;;  %80 = vmatpush1.msra.mxu0 %v61_v2  ;;  %v604_v7 = vpack.c.bf16 %v155_v5, %v153_v4  ;;  %v154_v8 = vld [vmem:[#allocation2 + $0x10] sm:$0xff]  ;;  %v157_v9 = vld [vmem:[#allocation2 + $0x28] sm:$0xff] }
  0x28   :  { %v159_v10 = vld [vmem:[#allocation2 + $0x38] sm:$0xff]  ;;  %567 = vmatmul.mubr.msk.f32.vlgmr.msra.gmra.mrb[0].mxu0 %vm75_vm0, %v60_v3  ;;  %v606_v11 = vpack.c.bf16 %v154_v8, %v152_v6  ;;  %v156_v13 = vld [vmem:[#allocation2 + $0x20] sm:$0xff]  ;;  %v158_v14 = vld [vmem:[#allocation2 + $0x30] sm:$0xff] }
  0x29   :  { %v608_v12 = vpack.c.bf16 %v159_v10, %v157_v9  ;;  %v161_v15 = vld [vmem:[#allocation2 + $0x48] sm:$0xff]  ;;  %605 = vmatprep.subr.bf16.mxu1 %v604_v7  ;;  %v163_v16 = vld [vmem:[#allocation2 + $0x58] sm:$0xff]  ;;  %v610_v17 = vpack.c.bf16 %v158_v14, %v156_v13  ;;  %v160_v19 = vld [vmem:[#allocation2 + $0x40] sm:$0xff] }
  0x2a   :  { %607 = vmatpush1.bf16.msra.mxu1 %v606_v11  ;;  %v612_v18 = vpack.c.bf16 %v163_v16, %v161_v15  ;;  %v162_v20 = vld [vmem:[#allocation2 + $0x50] sm:$0xff]  ;;  %v165_v21 = vld [vmem:[#allocation2 + $0x68] sm:$0xff]  ;;  %v167_v22 = vld [vmem:[#allocation2 + $0x78] sm:$0xff] }
  0x2b   :  { %609 = vmatprep.subr.bf16.mxu1 %v608_v12  ;;  %v614_v23 = vpack.c.bf16 %v162_v20, %v160_v19  ;;  %v616_v24 = vpack.c.bf16 %v167_v22, %v165_v21  ;;  %v164_v25 = vld [vmem:[#allocation2 + $0x60] sm:$0xff]  ;;  %v166_v26 = vld [vmem:[#allocation2 + $0x70] sm:$0xff]  ;;  %v169_v27 = vld [vmem:[#allocation2 + $0x88] sm:$0xff] }
  0x2c   :  { %v171_v28 = vld [vmem:[#allocation2 + $0x98] sm:$0xff]  ;;  %v618_v29 = vpack.c.bf16 %v166_v26, %v164_v25  ;;  %v168_v31 = vld [vmem:[#allocation2 + $0x80] sm:$0xff]  ;;  %v170_v32 = vld [vmem:[#allocation2 + $0x90] sm:$0xff] }
  0x2d   :  { %v620_v30 = vpack.c.bf16 %v171_v28, %v169_v27  ;;  %v173_v33 = vld [vmem:[#allocation2 + $0xa8] sm:$0xff]  ;;  %v175_v34 = vld [vmem:[#allocation2 + $0xb8] sm:$0xff]  ;;  %v622_v35 = vpack.c.bf16 %v170_v32, %v168_v31  ;;  %v172_v37 = vld [vmem:[#allocation2 + $0xa0] sm:$0xff] }
  0x2e   :  { %611 = vmatpush1.bf16.msra.mxu1 %v610_v17  ;;  %v624_v36 = vpack.c.bf16 %v175_v34, %v173_v33  ;;  %v174_v38 = vld [vmem:[#allocation2 + $0xb0] sm:$0xff]  ;;  %v177_v39 = vld [vmem:[#allocation2 + $0xc8] sm:$0xff]  ;;  %v179_v40 = vld [vmem:[#allocation2 + $0xd8] sm:$0xff] }
  0x2f   :  { %613 = vmatprep.subr.bf16.mxu1 %v612_v18  ;;  %v626_v41 = vpack.c.bf16 %v174_v38, %v172_v37  ;;  %v628_v42 = vpack.c.bf16 %v179_v40, %v177_v39  ;;  %v176_v43 = vld [vmem:[#allocation2 + $0xc0] sm:$0xff]  ;;  %v178_v44 = vld [vmem:[#allocation2 + $0xd0] sm:$0xff]  ;;  %v181_v45 = vld [vmem:[#allocation2 + $0xe8] sm:$0xff] }
  0x30   :  { %v183_v46 = vld [vmem:[#allocation2 + $0xf8] sm:$0xff]  ;;  %v630_v47 = vpack.c.bf16 %v178_v44, %v176_v43  ;;  %v180_v49 = vld [vmem:[#allocation2 + $0xe0] sm:$0xff]  ;;  %v182_v50 = vld [vmem:[#allocation2 + $0xf0] sm:$0xff] }
  0x31   :  { %v632_v48 = vpack.c.bf16 %v183_v46, %v181_v45  ;;  %v185_v51 = vld [vmem:[#allocation2 + $0x108] sm:$0xff]  ;;  %v187_v52 = vld [vmem:[#allocation2 + $0x118] sm:$0xff]  ;;  %v634_v53 = vpack.c.bf16 %v182_v50, %v180_v49  ;;  %v184_v55 = vld [vmem:[#allocation2 + $0x100] sm:$0xff] }
  0x32   :  { %615 = vmatpush1.bf16.msra.mxu1 %v614_v23  ;;  %v636_v54 = vpack.c.bf16 %v187_v52, %v185_v51  ;;  %v186_v56 = vld [vmem:[#allocation2 + $0x110] sm:$0xff]  ;;  %v189_v57 = vld [vmem:[#allocation2 + $0x128] sm:$0xff]  ;;  %v191_v58 = vld [vmem:[#allocation2 + $0x138] sm:$0xff] }
  0x33   :  { %617 = vmatprep.subr.bf16.mxu1 %v616_v24  ;;  %v638_v59 = vpack.c.bf16 %v186_v56, %v184_v55  ;;  %v640_v60 = vpack.c.bf16 %v191_v58, %v189_v57  ;;  %v188_v61 = vld [vmem:[#allocation2 + $0x120] sm:$0xff]  ;;  %v190_v62 = vld [vmem:[#allocation2 + $0x130] sm:$0xff]  ;;  %v193_v63 = vld [vmem:[#allocation2 + $0x148] sm:$0xff] }
  0x34   :  { %v195_v0 = vld [vmem:[#allocation2 + $0x158] sm:$0xff]  ;;  %v642_v1 = vpack.c.bf16 %v190_v62, %v188_v61  ;;  %v192_v3 = vld [vmem:[#allocation2 + $0x140] sm:$0xff]  ;;  %v194_v4 = vld [vmem:[#allocation2 + $0x150] sm:$0xff] }
  0x35   :  { %v644_v2 = vpack.c.bf16 %v195_v0, %v193_v63  ;;  %v197_v5 = vld [vmem:[#allocation2 + $0x168] sm:$0xff]  ;;  %v199_v6 = vld [vmem:[#allocation2 + $0x178] sm:$0xff]  ;;  %v646_v7 = vpack.c.bf16 %v194_v4, %v192_v3  ;;  %v196_v9 = vld [vmem:[#allocation2 + $0x160] sm:$0xff] }
  0x36   :  { %619 = vmatpush1.bf16.msra.mxu1 %v618_v29  ;;  %v648_v8 = vpack.c.bf16 %v199_v6, %v197_v5  ;;  %v198_v10 = vld [vmem:[#allocation2 + $0x170] sm:$0xff]  ;;  %v201_v11 = vld [vmem:[#allocation2 + $0x188] sm:$0xff]  ;;  %v203_v12 = vld [vmem:[#allocation2 + $0x198] sm:$0xff] }
  0x37   :  { %621 = vmatprep.subr.bf16.mxu1 %v620_v30  ;;  %v650_v13 = vpack.c.bf16 %v198_v10, %v196_v9  ;;  %v652_v14 = vpack.c.bf16 %v203_v12, %v201_v11  ;;  %v200_v15 = vld [vmem:[#allocation2 + $0x180] sm:$0xff]  ;;  %v202_v16 = vld [vmem:[#allocation2 + $0x190] sm:$0xff]  ;;  %v205_v17 = vld [vmem:[#allocation2 + $0x1a8] sm:$0xff] }
  0x38   :  { %v207_v18 = vld [vmem:[#allocation2 + $0x1b8] sm:$0xff]  ;;  %v654_v19 = vpack.c.bf16 %v202_v16, %v200_v15  ;;  %v204_v21 = vld [vmem:[#allocation2 + $0x1a0] sm:$0xff]  ;;  %v206_v22 = vld [vmem:[#allocation2 + $0x1b0] sm:$0xff] }
  0x39   :  { %v656_v20 = vpack.c.bf16 %v207_v18, %v205_v17  ;;  %v209_v23 = vld [vmem:[#allocation2 + $0x1c8] sm:$0xff]  ;;  %v211_v24 = vld [vmem:[#allocation2 + $0x1d8] sm:$0xff]  ;;  %v658_v25 = vpack.c.bf16 %v206_v22, %v204_v21  ;;  %v208_v27 = vld [vmem:[#allocation2 + $0x1c0] sm:$0xff] }
  0x3a   :  { %623 = vmatpush1.bf16.msra.mxu1 %v622_v35  ;;  %v660_v26 = vpack.c.bf16 %v211_v24, %v209_v23  ;;  %v210_v28 = vld [vmem:[#allocation2 + $0x1d0] sm:$0xff]  ;;  %v213_v30 = vld [vmem:[#allocation2 + $0x1e8] sm:$0xff]  ;;  %v215_v31 = vld [vmem:[#allocation2 + $0x1f8] sm:$0xff] }
  0x3b   :  { %625 = vmatprep.subr.bf16.mxu1 %v624_v36  ;;  %v662_v29 = vpack.c.bf16 %v210_v28, %v208_v27  ;;  %v664_v32 = vpack.c.bf16 %v215_v31, %v213_v30  ;;  %v212_v33 = vld [vmem:[#allocation2 + $0x1e0] sm:$0xff]  ;;  %v214_v34 = vld [vmem:[#allocation2 + $0x1f0] sm:$0xff]  ;;  %v302_v36 = vld [vmem:[#allocation4 + $0x8] sm:$0xff] }
  0x3c   :  { %v666_v35 = vpack.c.bf16 %v214_v34, %v212_v33  ;;  %v304_v37 = vld [vmem:[#allocation4 + $0x18] sm:$0xff]  ;;  %v301_v38 = vld [vmem:[#allocation4] sm:$0xff]  ;;  %v303_v40 = vld [vmem:[#allocation4 + $0x10] sm:$0xff] }
  0x3d   :  { %v668_v39 = vpack.c.bf16 %v304_v37, %v302_v36  ;;  %v670_v43 = vpack.c.bf16 %v303_v40, %v301_v38  ;;  %v305_v45 = vld [vmem:[#allocation4 + $0x20] sm:$0xff]  ;;  %v307_v46 = vld [vmem:[#allocation4 + $0x30] sm:$0xff]  ;;  %v342_v31 = vld [vmem:[#allocation4 + $0x148] sm:$0xff] }
  0x3e   :  { %627 = vmatpush1.bf16.msra.mxu1 %v626_v41  ;;  %v306_v41 = vld [vmem:[#allocation4 + $0x28] sm:$0xff]  ;;  %v674_v49 = vpack.c.bf16 %v307_v46, %v305_v45  ;;  %v309_v51 = vld [vmem:[#allocation4 + $0x40] sm:$0xff]  ;;  %v311_v52 = vld [vmem:[#allocation4 + $0x50] sm:$0xff] }
  0x3f   :  { %629 = vmatprep.subr.bf16.mxu1 %v628_v42  ;;  %v308_v42 = vld [vmem:[#allocation4 + $0x38] sm:$0xff]  ;;  %669 = vmatprep.subr.bf16.mxu0 %v668_v39  ;;  %v678_v55 = vpack.c.bf16 %v311_v52, %v309_v51  ;;  %v313_v57 = vld [vmem:[#allocation4 + $0x60] sm:$0xff]  ;;  %v315_v58 = vld [vmem:[#allocation4 + $0x70] sm:$0xff] }
  0x40   :  { %v672_v44 = vpack.c.bf16 %v308_v42, %v306_v41  ;;  %671 = vmatpush1.bf16.msra.mxu0 %v670_v43  ;;  %v682_v61 = vpack.c.bf16 %v315_v58, %v313_v57  ;;  %v317_v63 = vld [vmem:[#allocation4 + $0x80] sm:$0xff]  ;;  %v319_v0 = vld [vmem:[#allocation4 + $0x90] sm:$0xff]  ;;  %v346_v37 = vld [vmem:[#allocation4 + $0x168] sm:$0xff] }
  0x41   :  { %v686_v3 = vpack.c.bf16 %v319_v0, %v317_v63  ;;  %v321_v5 = vld [vmem:[#allocation4 + $0xa0] sm:$0xff]  ;;  %v323_v6 = vld [vmem:[#allocation4 + $0xb0] sm:$0xff]  ;;  %v348_v38 = vld [vmem:[#allocation4 + $0x178] sm:$0xff] }
  0x42   :  { %631 = vmatpush1.bf16.msra.mxu1 %v630_v47  ;;  %v310_v47 = vld [vmem:[#allocation4 + $0x48] sm:$0xff]  ;;  %673 = vmatprep.subr.bf16.mxu0 %v672_v44  ;;  %v690_v9 = vpack.c.bf16 %v323_v6, %v321_v5  ;;  %v325_v11 = vld [vmem:[#allocation4 + $0xc0] sm:$0xff]  ;;  %v327_v12 = vld [vmem:[#allocation4 + $0xd0] sm:$0xff]  ;;  %v712_v40 = vpack.c.bf16 %v348_v38, %v346_v37 }
  0x43   :  { %633 = vmatprep.subr.bf16.mxu1 %v632_v48  ;;  %v312_v48 = vld [vmem:[#allocation4 + $0x58] sm:$0xff]  ;;  %v694_v15 = vpack.c.bf16 %v327_v12, %v325_v11  ;;  %v329_v17 = vld [vmem:[#allocation4 + $0xe0] sm:$0xff]  ;;  %v331_v18 = vld [vmem:[#allocation4 + $0xf0] sm:$0xff] }
  0x44   :  { %v676_v50 = vpack.c.bf16 %v312_v48, %v310_v47  ;;  %675 = vmatpush1.bf16.msra.mxu0 %v674_v49  ;;  %v698_v21 = vpack.c.bf16 %v331_v18, %v329_v17  ;;  %v333_v23 = vld [vmem:[#allocation4 + $0x100] sm:$0xff]  ;;  %v335_v24 = vld [vmem:[#allocation4 + $0x110] sm:$0xff]  ;;  %v350_v43 = vld [vmem:[#allocation4 + $0x188] sm:$0xff] }
  0x45   :  { %v702_v27 = vpack.c.bf16 %v335_v24, %v333_v23  ;;  %v339_v30 = vld [vmem:[#allocation4 + $0x130] sm:$0xff]  ;;  %v345_v41 = vld [vmem:[#allocation4 + $0x160] sm:$0xff]  ;;  %v352_v44 = vld [vmem:[#allocation4 + $0x198] sm:$0xff] }
  0x46   :  { %635 = vmatpush1.bf16.msra.mxu1 %v634_v53  ;;  %v314_v53 = vld [vmem:[#allocation4 + $0x68] sm:$0xff]  ;;  %677 = vmatprep.subr.bf16.mxu0 %v676_v50  ;;  %v343_v36 = vld [vmem:[#allocation4 + $0x150] sm:$0xff]  ;;  %v716_v46 = vpack.c.bf16 %v352_v44, %v350_v43  ;;  %v349_v47 = vld [vmem:[#allocation4 + $0x180] sm:$0xff] }
  0x47   :  { %637 = vmatprep.subr.bf16.mxu1 %v636_v54  ;;  %v316_v54 = vld [vmem:[#allocation4 + $0x78] sm:$0xff]  ;;  %v347_v42 = vld [vmem:[#allocation4 + $0x170] sm:$0xff]  ;;  %v354_v49 = vld [vmem:[#allocation4 + $0x1a8] sm:$0xff] }
  0x48   :  { %v680_v56 = vpack.c.bf16 %v316_v54, %v314_v53  ;;  %679 = vmatpush1.bf16.msra.mxu0 %v678_v55  ;;  %v714_v45 = vpack.c.bf16 %v347_v42, %v345_v41  ;;  %v351_v48 = vld [vmem:[#allocation4 + $0x190] sm:$0xff]  ;;  %v356_v50 = vld [vmem:[#allocation4 + $0x1b8] sm:$0xff]  ;;  %v353_v53 = vld [vmem:[#allocation4 + $0x1a0] sm:$0xff] }
  0x49   :  { %v718_v51 = vpack.c.bf16 %v351_v48, %v349_v47  ;;  %v720_v52 = vpack.c.bf16 %v356_v50, %v354_v49  ;;  %v355_v54 = vld [vmem:[#allocation4 + $0x1b0] sm:$0xff]  ;;  %v358_v55 = vld [vmem:[#allocation4 + $0x1c8] sm:$0xff]  ;;  %v364_v12 = vld [vmem:[#allocation4 + $0x1f8] sm:$0xff] }
  0x4a   :  { %639 = vmatpush1.bf16.msra.mxu1 %v638_v59  ;;  %v318_v59 = vld [vmem:[#allocation4 + $0x88] sm:$0xff]  ;;  %681 = vmatprep.subr.bf16.mxu0 %v680_v56  ;;  %v360_v56 = vld [vmem:[#allocation4 + $0x1d8] sm:$0xff]  ;;  %v722_v57 = vpack.c.bf16 %v355_v54, %v353_v53  ;;  %v466_v17 = vld [vmem:[%s1033_s7 + $0x80] sm:$0xff] }
  0x4b   :  { %641 = vmatprep.subr.bf16.mxu1 %v640_v60  ;;  %v320_v60 = vld [vmem:[#allocation4 + $0x98] sm:$0xff]  ;;  %v724_v58 = vpack.c.bf16 %v360_v56, %v358_v55  ;;  %v362_v11 = vld [vmem:[#allocation4 + $0x1e8] sm:$0xff]  ;;  %v456_v38 = vld [vmem:[%s1033_s7 + $0x30] sm:$0xff] }
  0x4c   :  { %v684_v62 = vpack.c.bf16 %v320_v60, %v318_v59  ;;  %683 = vmatpush1.bf16.msra.mxu0 %v682_v61  ;;  %v65_v59 = vlaneseq  ;;  %v467_v18 = vld [vmem:[%s1033_s7 + $0x88] sm:$0xff]  ;;  %v469_v23 = vld [vmem:[%s1033_s7 + $0x98] sm:$0xff]  ;;  %v458_v44 = vld [vmem:[%s1033_s7 + $0x40] sm:$0xff] }
  0x4d   :  { %v475_v41 = vld [vmem:[%s1033_s7 + $0xc8] sm:$0xff]  ;;  %v477_v47 = vld [vmem:[%s1033_s7 + $0xd8] sm:$0xff]  ;;  %v460_v50 = vld [vmem:[%s1033_s7 + $0x50] sm:$0xff] }
  0x4e   :  { %643 = vmatpush1.bf16.msra.mxu1 %v642_v1  ;;  %v322_v1 = vld [vmem:[#allocation4 + $0xa8] sm:$0xff]  ;;  %685 = vmatprep.subr.bf16.mxu0 %v684_v62  ;;  %v66_v60 = vshrl.u32 %v65_v59, 7  ;;  %v63_v62 = vld [vmem:[%s1028_s2] sm:$0x3] }
  0x4f   :  { %645 = vmatprep.subr.bf16.mxu1 %v644_v2  ;;  %v324_v2 = vld [vmem:[#allocation4 + $0xb8] sm:$0xff]  ;;  %v479_v53 = vld [vmem:[%s1033_s7 + $0xe8] sm:$0xff]  ;;  %v216_v56 = vld [vmem:[%s1030_s4] sm:$0x3] }
  0x50   :  { %v688_v4 = vpack.c.bf16 %v324_v2, %v322_v1  ;;  %687 = vmatpush1.bf16.msra.mxu0 %v686_v3  ;;  %v905_v61 = vsub.s32 0, %v66_v60  ;;  %v910_v63 = vsub.s32 1, %v66_v60 }
  0x52   :  { %647 = vmatpush1.bf16.msra.mxu1 %v646_v7  ;;  %v326_v7 = vld [vmem:[#allocation4 + $0xc8] sm:$0xff]  ;;  %689 = vmatprep.subr.bf16.mxu0 %v688_v4  ;;  %v68_v0 = vrot.slane %v63_v62, %v905_v61  ;;  %v72_v1 = vrot.slane %v63_v62, %v910_v63 }
  0x53   :  { %649 = vmatprep.subr.bf16.mxu1 %v648_v8  ;;  %v328_v8 = vld [vmem:[#allocation4 + $0xd8] sm:$0xff] }
  0x54   :  { %v692_v10 = vpack.c.bf16 %v328_v8, %v326_v7  ;;  %691 = vmatpush1.bf16.msra.mxu0 %v690_v9  ;;  %v357_v8 = vld [vmem:[#allocation4 + $0x1c0] sm:$0xff]  ;;  %v359_v9 = vld [vmem:[#allocation4 + $0x1d0] sm:$0xff] }
  0x56   :  { %651 = vmatpush1.bf16.msra.mxu1 %v650_v13  ;;  %v330_v13 = vld [vmem:[#allocation4 + $0xe8] sm:$0xff]  ;;  %693 = vmatprep.subr.bf16.mxu0 %v692_v10  ;;  %v726_v10 = vpack.c.bf16 %v359_v9, %v357_v8  ;;  %v464_v9 = vld [vmem:[%s1033_s7 + $0x70] sm:$0xff] }
  0x57   :  { %653 = vmatprep.subr.bf16.mxu1 %v652_v14  ;;  %v332_v14 = vld [vmem:[#allocation4 + $0xf8] sm:$0xff] }
  0x58   :  { %v696_v16 = vpack.c.bf16 %v332_v14, %v330_v13  ;;  %695 = vmatpush1.bf16.msra.mxu0 %v694_v15  ;;  %v728_v13 = vpack.c.bf16 %v364_v12, %v362_v11  ;;  %v361_v14 = vld [vmem:[#allocation4 + $0x1e0] sm:$0xff]  ;;  %v363_v15 = vld [vmem:[#allocation4 + $0x1f0] sm:$0xff] }
  0x59   :  { %v365_v12 = vld [vmem:[%s1032_s6] sm:$0x3] }
  0x5a   :  { %655 = vmatpush1.bf16.msra.mxu1 %v654_v19  ;;  %v334_v19 = vld [vmem:[#allocation4 + $0x108] sm:$0xff]  ;;  %697 = vmatprep.subr.bf16.mxu0 %v696_v16  ;;  %v730_v16 = vpack.c.bf16 %v363_v15, %v361_v14  ;;  %v374_v14 = vrot.slane %v365_v12, %v910_v63 }
  0x5b   :  { %657 = vmatprep.subr.bf16.mxu1 %v656_v20  ;;  %v336_v20 = vld [vmem:[#allocation4 + $0x118] sm:$0xff] }
  0x5c   :  { %v700_v22 = vpack.c.bf16 %v336_v20, %v334_v19  ;;  %699 = vmatpush1.bf16.msra.mxu0 %v698_v21  ;;  %v450_v19 = vld [vmem:[%s1033_s7] sm:$0xff]  ;;  %v732_v20 = vpack.c.bf16 %v467_v18, %v466_v17  ;;  %v451_v21 = vld [vmem:[%s1033_s7 + $0x8] sm:$0xff] }
  0x5d   :  { %v734_v24 = vpack.c.bf16 %v451_v21, %v450_v19 }
  0x5e   :  { %659 = vmatpush1.bf16.msra.mxu1 %v658_v25  ;;  %v338_v25 = vld [vmem:[#allocation4 + $0x128] sm:$0xff]  ;;  %701 = vmatprep.subr.bf16.mxu0 %v700_v22  ;;  %v468_v22 = vld [vmem:[%s1033_s7 + $0x90] sm:$0xff] }
  0x5f   :  { %661 = vmatprep.subr.bf16.mxu1 %v660_v26  ;;  %v340_v26 = vld [vmem:[#allocation4 + $0x138] sm:$0xff] }
  0x60   :  { %v704_v28 = vpack.c.bf16 %v340_v26, %v338_v25  ;;  %703 = vmatpush1.bf16.msra.mxu0 %v702_v27  ;;  %v736_v25 = vpack.c.bf16 %v469_v23, %v468_v22  ;;  %v452_v26 = vld [vmem:[%s1033_s7 + $0x10] sm:$0xff]  ;;  %v453_v27 = vld [vmem:[%s1033_s7 + $0x18] sm:$0xff]  ;;  %v568_v22 = vld [vmem:[%s1034_s8] ss:$0 sm:$0xff] }
  0x62   :  { %663 = vmatpush1.bf16.msra.mxu1 %v662_v29  ;;  %v337_v29 = vld [vmem:[#allocation4 + $0x120] sm:$0xff]  ;;  %705 = vmatprep.subr.bf16.mxu0 %v704_v28 }
  0x63   :  { %665 = vmatprep.subr.bf16.mxu1 %v664_v32  ;;  %v344_v32 = vld [vmem:[#allocation4 + $0x158] sm:$0xff]  ;;  %v706_v33 = vpack.c.bf16 %v339_v30, %v337_v29  ;;  %v470_v28 = vld [vmem:[%s1033_s7 + $0xa0] sm:$0xff]  ;;  %v471_v29 = vld [vmem:[%s1033_s7 + $0xa8] sm:$0xff]  ;;  %v738_v30 = vpack.c.bf16 %v453_v27, %v452_v26 }
  0x64   :  { %v708_v34 = vpack.c.bf16 %v344_v32, %v342_v31  ;;  %v740_v31 = vpack.c.bf16 %v471_v29, %v470_v28  ;;  %v454_v32 = vld [vmem:[%s1033_s7 + $0x20] sm:$0xff] }
  0x65   :  { %707 = vmatpush1.bf16.msra.mxu0 %v706_v33  ;;  %v455_v33 = vld [vmem:[%s1033_s7 + $0x28] sm:$0xff] }
  0x66   :  { %667 = vmatpush1.bf16.msra.mxu1 %v666_v35  ;;  %v341_v35 = vld [vmem:[#allocation4 + $0x140] sm:$0xff]  ;;  %709 = vmatprep.subr.bf16.mxu0 %v708_v34  ;;  %v472_v34 = vld [vmem:[%s1033_s7 + $0xb0] sm:$0xff] }
  0x67   :  { %v710_v39 = vpack.c.bf16 %v343_v36, %v341_v35  ;;  %733 = vmatprep.subr.bf16.mxu1 %v732_v20  ;;  %v473_v35 = vld [vmem:[%s1033_s7 + $0xb8] sm:$0xff]  ;;  %v742_v36 = vpack.c.bf16 %v455_v33, %v454_v32 }
  0x68   :  { %v744_v37 = vpack.c.bf16 %v473_v35, %v472_v34 }
  0x69   :  { %711 = vmatpush1.bf16.msra.mxu0 %v710_v39  ;;  %v457_v39 = vld [vmem:[%s1033_s7 + $0x38] sm:$0xff] }
  0x6a   :  { %713 = vmatprep.subr.bf16.mxu0 %v712_v40  ;;  %v474_v40 = vld [vmem:[%s1033_s7 + $0xc0] sm:$0xff]  ;;  %v746_v42 = vpack.c.bf16 %v457_v39, %v456_v38 }
  0x6b   :  { %v748_v43 = vpack.c.bf16 %v475_v41, %v474_v40 }
  0x6d   :  { %715 = vmatpush1.bf16.msra.mxu0 %v714_v45  ;;  %v459_v45 = vld [vmem:[%s1033_s7 + $0x48] sm:$0xff] }
  0x6e   :  { %717 = vmatprep.subr.bf16.mxu0 %v716_v46  ;;  %v476_v46 = vld [vmem:[%s1033_s7 + $0xd0] sm:$0xff]  ;;  %v750_v48 = vpack.c.bf16 %v459_v45, %v458_v44 }
  0x6f   :  { %v752_v49 = vpack.c.bf16 %v477_v47, %v476_v46 }
  0x71   :  { %719 = vmatpush1.bf16.msra.mxu0 %v718_v51  ;;  %v461_v51 = vld [vmem:[%s1033_s7 + $0x58] sm:$0xff] }
  0x72   :  { %721 = vmatprep.subr.bf16.mxu0 %v720_v52  ;;  %v478_v52 = vld [vmem:[%s1033_s7 + $0xe0] sm:$0xff]  ;;  %v754_v54 = vpack.c.bf16 %v461_v51, %v460_v50 }
  0x73   :  { %v756_v55 = vpack.c.bf16 %v479_v53, %v478_v52 }
  0x75   :  { %723 = vmatpush1.bf16.msra.mxu0 %v722_v57  ;;  %v221_v57 = vrot.slane %v216_v56, %v905_v61 }
  0x76   :  { %725 = vmatprep.subr.bf16.mxu0 %v724_v58  ;;  %v225_v58 = vrot.slane %v216_v56, %v910_v63 }
  0x79   :  { %727 = vmatpush1.bf16.msra.mxu0 %v726_v10  ;;  %v465_v10 = vld [vmem:[%s1033_s7 + $0x78] sm:$0xff] }
  0x7a   :  { %729 = vmatprep.subr.bf16.mxu0 %v728_v13  ;;  %v762_v11 = vpack.c.bf16 %v465_v10, %v464_v9  ;;  %v370_v13 = vrot.slane %v365_v12, %v905_v61 }
  0x7d   :  { %731 = vmatpush1.bf16.msra.mxu0 %v730_v16 }
  0xfb   :  { %v145_v2 = vpop.f32.mrb[0].mxu0 }
  0xfc   :  { %v146_v3 = vadd.f32 %v145_v2, %v68_v0  ;;  %v147_v4 = vpop.f32.mrb[1].mxu0 }
  0xfd   :  { %v148_v5 = vadd.f32 %v147_v4, %v72_v1  ;;  %v463_v4 = vld [vmem:[%s1033_s7 + $0x68] sm:$0xff] }
  0xfe   :  { %v150_v7 = vmax.f32 %v146_v3, 0.0  ;;  %v462_v3 = vld [vmem:[%s1033_s7 + $0x60] sm:$0xff] }
  0xff   :  { %v151_v6 = vmax.f32 %v148_v5, 0.0  ;;  %v758_v5 = vpack.c.bf16 %v463_v4, %v462_v3 }
 0x101   :  { %292 = vmatprep.mubr.f32.mxu1 %v151_v6  ;;  %v480_v6 = vld [vmem:[%s1033_s7 + $0xf0] sm:$0xff] }
 0x102   :  { %293 = vmatmul.mubr.f32.vlgmr.msra.gmra.mrb[0].mxu1 %v150_v7  ;;  %v481_v7 = vld [vmem:[%s1033_s7 + $0xf8] sm:$0xff] }
 0x103   :  { %735 = vmatpush3.bf16.msra.mxu1 %v734_v24  ;;  %v760_v8 = vpack.c.bf16 %v481_v7, %v480_v6 }
 0x104   :  { %737 = vmatprep.subr.bf16.mxu1 %v736_v25 }
 0x107   :  { %739 = vmatpush3.bf16.msra.mxu1 %v738_v30 }
 0x108   :  { %741 = vmatprep.subr.bf16.mxu1 %v740_v31 }
 0x10b   :  { %743 = vmatpush3.bf16.msra.mxu1 %v742_v36 }
 0x10c   :  { %745 = vmatprep.subr.bf16.mxu1 %v744_v37 }
 0x10f   :  { %747 = vmatpush3.bf16.msra.mxu1 %v746_v42 }
 0x110   :  { %749 = vmatprep.subr.bf16.mxu1 %v748_v43 }
 0x113   :  { %751 = vmatpush3.bf16.msra.mxu1 %v750_v48 }
 0x114   :  { %753 = vmatprep.subr.bf16.mxu1 %v752_v49 }
 0x117   :  { %755 = vmatpush3.bf16.msra.mxu1 %v754_v54 }
 0x118   :  { %757 = vmatprep.subr.bf16.mxu1 %v756_v55 }
 0x11b   :  { %759 = vmatpush3.bf16.msra.mxu1 %v758_v5 }
 0x11c   :  { %761 = vmatprep.subr.bf16.mxu1 %v760_v8 }
 0x11f   :  { %763 = vmatpush3.bf16.msra.mxu1 %v762_v11 }
 0x1d5   :  { %v294_v59 = vpop.f32.mrb[0].mxu1 }
 0x1d6   :  { %v295_v60 = vadd.f32 %v294_v59, %v221_v57  ;;  %v296_v62 = vpop.f32.mrb[1].mxu1 }
 0x1d7   :  { %v297_v0 = vadd.f32 %v296_v62, %v225_v58 }
 0x1d8   :  { %v299_v2 = vmax.f32 %v295_v60, 0.0 }
 0x1d9   :  { %v300_v1 = vmax.f32 %v297_v0, 0.0 }
 0x1db   :  { %441 = vmatprep.mubr.f32.mxu0 %v300_v1 }
 0x1dc   :  { %442 = vmatmul.mubr.f32.vlgmr.msra.gmra.mrb[2].mxu0 %v299_v2 }
 0x2af   :  { %v443_v15 = vpop.f32.mrb[2].mxu0 }
 0x2b0   :  { %v444_v16 = vadd.f32 %v443_v15, %v370_v13  ;;  %v445_v17 = vpop.f32.mrb[3].mxu0 }
 0x2b1   :  { %v446_v18 = vadd.f32 %v445_v17, %v374_v14 }
 0x2b2   :  { %v448_v20 = vmax.f32 %v444_v16, 0.0 }
 0x2b3   :  { %v449_v19 = vmax.f32 %v446_v18, 0.0 }
 0x2b5   :  { %553 = vmatprep.mubr.f32.mxu1 %v449_v19 }
 0x2b6   :  { %554 = vmatmul.mubr.f32.vlgmr.msra.gmra.mrb[2].mxu1 %v448_v20 }
 0x389   :  { %v601_v21 = vpop.f32.mrb[2].mxu1 }
 0x38a   :  { %v602_v23 = vpop.f32.mrb[3].mxu1 }
 0x38b   :  { %v603_v24 = vadd.f32 %v602_v23, %v601_v21 }
 0x38d   :  { %v556_v25 = vadd.f32 %v603_v24, %v568_v22 }
 0x38f   :  { %560 = vst.msk [vmem:[%s1035_s9] sm:$0xff] %vm559_vm1, %v556_v25 }
 0x390   :  { %565 = vsyncpa [#allocation3], 1 }
 0x391   :  { %566 = vsyncpa [#allocation5], 1 }

</bundles_post_ra>
